<compile_context>
chip_gen: v7x
topology: tpu7x:2x2x1
jax: 0.10.0
libtpu: 0.0.40
codegen_flags: <defaults>
</compile_context>

<pallas_src>
import math
import jax
import jax.numpy as jnp
from jax.experimental import pallas as pl
from jax.experimental.pallas import tpu as pltpu

# SOSRA tableau coefficients (from the module)
C_A21_DZ = 1.3371632704399763
C_A21_D1 = 0.6923962376159507
C_A31_DZ = 3.30564519858
C_A31_D1 = -3.1609142252828395
C_A31_D2 = 4.1609142252828395
C_B1 = 0.2889874966892885
C_B2 = 0.6859880440839937
C_B3 = 0.025024459226717772


def _make_sosra_kernel(dt: float):
    dt = float(dt)

    def kernel(state_ref, dw_ref, aux_ref, w_ref, b_ref,
               out_state_ref, drift1_ref):
        x = state_ref[...]                         # (tm, H) f32
        dW = dw_ref[...]                           # (tm, H) f32
        dZ = 0.5 * (dW + aux_ref[...])             # (tm, H) f32

        Wb = w_ref[...]                            # (H, H) bf16 (MXU operand)
        # Hoist the (1,H)->(tm,H) bias broadcast once (JAX does not CSE it).
        b_t = jnp.broadcast_to(b_ref[...], x.shape)

        def drift(s):
            # bf16 operands, f32 accumulation on the MXU.
            return jnp.dot(s.astype(jnp.bfloat16), Wb,
                           preferred_element_type=jnp.float32) + b_t

        d1 = drift(x)
        s2 = x + C_A21_DZ * dZ + (C_A21_D1 * dt) * d1
        d2 = drift(s2)
        s3 = x + C_A31_DZ * dZ + (C_A31_D1 * d1 + C_A31_D2 * d2) * dt
        d3 = drift(s3)

        drift_tot = C_B1 * d1 + C_B2 * d2 + C_B3 * d3
        out_state_ref[...] = (x + dW + drift_tot * dt).astype(out_state_ref.dtype)
        drift1_ref[...] = d1.astype(drift1_ref.dtype)

    return kernel


def _pick_tm(B: int) -> int:
    """Largest tile <= 512 dividing B; prefer >= 2 grid steps (v7x megacore)."""
    cap = min(512, B // 2) if B >= 16 else B
    for tm in range(cap, 0, -1):
        if B % tm == 0 and (tm % 8 == 0 or tm == B):
            return tm
    return B


def sosra_step(state, dW, aux, W, b, dt, *, tm=None):
    """One SOSRA step. Returns (new_state, drift_1, dW)."""
    B, H = state.shape
    if tm is None:
        tm = _pick_tm(B)
    assert B % tm == 0, (B, tm)

    # Store W as bf16: halves the weight DMA and matches the MXU operand type.
    W_bf = W if W.dtype == jnp.bfloat16 else W.astype(jnp.bfloat16)

    kernel = _make_sosra_kernel(dt)

    row_spec = pl.BlockSpec((tm, H), lambda i: (i, 0))
    w_spec = pl.BlockSpec((H, H), lambda i: (0, 0))     # constant index -> DMA'd once
    b_spec = pl.BlockSpec((1, H), lambda i: (0, 0))

    out_shapes = (
        jax.ShapeDtypeStruct((B, H), state.dtype),   # new state
        jax.ShapeDtypeStruct((B, H), jnp.float32),   # drift_1
    )

    new_state, drift_1 = pl.pallas_call(
        kernel,
        out_shape=out_shapes,
        grid_spec=pltpu.PrefetchScalarGridSpec(
            num_scalar_prefetch=0,
            grid=(B // tm,),
            in_specs=[row_spec, row_spec, row_spec, w_spec, b_spec],
            out_specs=[row_spec, row_spec],
        ),
        compiler_params=pltpu.CompilerParams(
            dimension_semantics=("parallel",)),
    )(state, dW, aux, W_bf, b)

    # dW is returned unchanged (like torch) -- no kernel passthrough needed.
    return new_state, drift_1, dW


def _sosra_math(state, dW, aux, b, dt, matvec):
    dZ = 0.5 * (dW + aux)
    drift = lambda s: matvec(s) + b
    d1 = drift(state)
    s2 = state + C_A21_DZ * dZ + C_A21_D1 * d1 * dt
    d2 = drift(s2)
    s3 = state + C_A31_DZ * dZ + (C_A31_D1 * d1 + C_A31_D2 * d2) * dt
    d3 = drift(s3)
    dtot = C_B1 * d1 + C_B2 * d2 + C_B3 * d3
    return state + dW + dtot * dt, d1, dW


def sosra_ref_f32(state, dW, aux, W, b, dt):
    """Pure-f32 JAX reference mirroring the PyTorch forward."""
    return _sosra_math(state, dW, aux, b, dt, lambda s: s @ W)


def sosra_ref_bf16(state, dW, aux, W_bf, b, dt):
    """Reference with the same bf16-operand / f32-accum matmul as the kernel."""
    mv = lambda s: jnp.dot(s.astype(jnp.bfloat16), W_bf,
                           preferred_element_type=jnp.float32)
    return _sosra_math(state, dW, aux, b, dt, mv)


if __name__ == "__main__":
    B, H = 256, 128          # small, but tm=128 -> grid=2 (both v7x TCs busy)
    dt = 0.01
    strong = True            # hparams.strong

    key = jax.random.PRNGKey(0)
    k_state, k_w, k_b, k_dw, k_aux = jax.random.split(key, 5)

    state = jax.random.normal(k_state, (B, H), dtype=jnp.float32)
    W = 0.1 * jax.random.normal(k_w, (H, H), dtype=jnp.float32)
    b = 0.1 * jax.random.normal(k_b, (1, H), dtype=jnp.float32)

    sqrtdt = math.sqrt(dt)
    dW = jax.random.normal(k_dw, (B, H), dtype=jnp.float32) * sqrtdt
    if strong:
        # dZ = 0.5 * (dW + randn * sqrt(dt) / sqrt(3))
        aux = jax.random.normal(k_aux, (B, H), dtype=jnp.float32) * sqrtdt / math.sqrt(3.0)
    else:
        # dZ = 0.5 * dW + 0.5 * s * sqrt(dt) / sqrt(3),  s in {-1, +1}
        s = 2.0 * jax.random.randint(k_aux, (B, H), 0, 2).astype(jnp.float32) - 1.0
        aux = s * sqrtdt / math.sqrt(3.0)

    new_state, drift_1, dW_out = sosra_step(state, dW, aux, W, b, dt)
    jax.block_until_ready((new_state, drift_1, dW_out))

    # Tight check against a reference that uses the same bf16-operand matmul.
    W_bf = W.astype(jnp.bfloat16)
    rs_bf, rd1_bf, _ = sosra_ref_bf16(state, dW, aux, W_bf, b, dt)
    assert jnp.allclose(new_state, rs_bf, atol=1e-4, rtol=1e-4)
    assert jnp.allclose(drift_1, rd1_bf, atol=1e-4, rtol=1e-4)

    # Loose check against the pure-f32 module math (bf16 MXU operands bound).
    rs_f32, rd1_f32, rdw = sosra_ref_f32(state, dW, aux, W, b, dt)
    assert jnp.allclose(new_state, rs_f32, atol=5e-2, rtol=5e-2)
    assert jnp.allclose(drift_1, rd1_f32, atol=5e-2, rtol=5e-2)
    assert jnp.array_equal(dW_out, dW)   # dW returned unchanged, no copy

    print("KERNEL_OK")
</pallas_src>

<mosaic_0001>
module attributes {stable_mosaic.version = 11 : i64} {
  func.func @kernel(%arg0: i32, %arg1: memref<128x128xf32, #tpu.memory_space<vmem>>, %arg2: memref<128x128xf32, #tpu.memory_space<vmem>>, %arg3: memref<128x128xf32, #tpu.memory_space<vmem>>, %arg4: memref<128x128xbf16, #tpu.memory_space<vmem>>, %arg5: memref<1x128xf32, #tpu.memory_space<vmem>>, %arg6: memref<128x128xf32, #tpu.memory_space<vmem>>, %arg7: memref<128x128xf32, #tpu.memory_space<vmem>>) attributes {dimension_semantics = [#tpu.dimension_semantics<parallel>], iteration_bounds = array<i64: 2>, scalar_prefetch = 0 : i64, scratch_operands = 0 : i64, tpu.core_type = #tpu.core_type<tc>, window_params = [{transform_indices = @transform_0, window_bounds = array<i64: 128, 128>}, {transform_indices = @transform_1, window_bounds = array<i64: 128, 128>}, {transform_indices = @transform_2, window_bounds = array<i64: 128, 128>}, {pipeline_mode = #tpu.pipeline_mode<synchronous>, transform_indices = @transform_3, window_bounds = array<i64: 128, 128>}, {pipeline_mode = #tpu.pipeline_mode<synchronous>, transform_indices = @transform_4, window_bounds = array<i64: 1, 128>}, {transform_indices = @transform_5, window_bounds = array<i64: 128, 128>}, {transform_indices = @transform_6, window_bounds = array<i64: 128, 128>}]} {
    %c0 = arith.constant 0 : index
    %c0_0 = arith.constant 0 : index
    %0 = vector.load %arg1[%c0, %c0_0] : memref<128x128xf32, #tpu.memory_space<vmem>>, vector<128x128xf32>
    %c0_1 = arith.constant 0 : index
    %c0_2 = arith.constant 0 : index
    %1 = vector.load %arg2[%c0_1, %c0_2] : memref<128x128xf32, #tpu.memory_space<vmem>>, vector<128x128xf32>
    %c0_3 = arith.constant 0 : index
    %c0_4 = arith.constant 0 : index
    %2 = vector.load %arg3[%c0_3, %c0_4] : memref<128x128xf32, #tpu.memory_space<vmem>>, vector<128x128xf32>
    %3 = arith.addf %1, %2 : vector<128x128xf32>
    %cst = arith.constant 5.000000e-01 : f32
    %4 = vector.broadcast %cst : f32 to vector<128x128xf32>
    %5 = arith.mulf %4, %3 : vector<128x128xf32>
    %c0_5 = arith.constant 0 : index
    %c0_6 = arith.constant 0 : index
    %6 = vector.load %arg4[%c0_5, %c0_6] : memref<128x128xbf16, #tpu.memory_space<vmem>>, vector<128x128xbf16>
    %c0_7 = arith.constant 0 : index
    %c0_8 = arith.constant 0 : index
    %7 = vector.load %arg5[%c0_7, %c0_8] : memref<1x128xf32, #tpu.memory_space<vmem>>, vector<1x128xf32>
    %8 = vector.shape_cast %7 : vector<1x128xf32> to vector<1x128xf32>
    %9 = vector.broadcast %8 : vector<1x128xf32> to vector<128x128xf32>
    %10 = arith.truncf %0 : vector<128x128xf32> to vector<128x128xbf16>
    %cst_9 = arith.constant dense<0.000000e+00> : vector<128x128xf32>
    %11 = tpu.matmul %10, %6, %cst_9 {dimension_numbers = #tpu.dot_dimension_numbers<[1], [0], [0], [1], [0, 0, 1, 1], [], []>} : vector<128x128xbf16>, vector<128x128xbf16>, vector<128x128xf32> -> vector<128x128xf32>
    %12 = arith.addf %11, %9 : vector<128x128xf32>
    %cst_10 = arith.constant 1.33716333 : f32
    %13 = vector.broadcast %cst_10 : f32 to vector<128x128xf32>
    %14 = arith.mulf %13, %5 : vector<128x128xf32>
    %15 = arith.addf %0, %14 : vector<128x128xf32>
    %cst_11 = arith.constant 0.00692396238 : f32
    %16 = vector.broadcast %cst_11 : f32 to vector<128x128xf32>
    %17 = arith.mulf %16, %12 : vector<128x128xf32>
    %18 = arith.addf %15, %17 : vector<128x128xf32>
    %19 = arith.truncf %18 : vector<128x128xf32> to vector<128x128xbf16>
    %cst_12 = arith.constant dense<0.000000e+00> : vector<128x128xf32>
    %20 = tpu.matmul %19, %6, %cst_12 {dimension_numbers = #tpu.dot_dimension_numbers<[1], [0], [0], [1], [0, 0, 1, 1], [], []>} : vector<128x128xbf16>, vector<128x128xbf16>, vector<128x128xf32> -> vector<128x128xf32>
    %21 = arith.addf %20, %9 : vector<128x128xf32>
    %cst_13 = arith.constant 3.30564523 : f32
    %22 = vector.broadcast %cst_13 : f32 to vector<128x128xf32>
    %23 = arith.mulf %22, %5 : vector<128x128xf32>
    %24 = arith.addf %0, %23 : vector<128x128xf32>
    %cst_14 = arith.constant -3.16091418 : f32
    %25 = vector.broadcast %cst_14 : f32 to vector<128x128xf32>
    %26 = arith.mulf %25, %12 : vector<128x128xf32>
    %cst_15 = arith.constant 4.16091442 : f32
    %27 = vector.broadcast %cst_15 : f32 to vector<128x128xf32>
    %28 = arith.mulf %27, %21 : vector<128x128xf32>
    %29 = arith.addf %26, %28 : vector<128x128xf32>
    %cst_16 = arith.constant 0.00999999977 : f32
    %30 = vector.broadcast %cst_16 : f32 to vector<128x128xf32>
    %31 = arith.mulf %29, %30 : vector<128x128xf32>
    %32 = arith.addf %24, %31 : vector<128x128xf32>
    %33 = arith.truncf %32 : vector<128x128xf32> to vector<128x128xbf16>
    %cst_17 = arith.constant dense<0.000000e+00> : vector<128x128xf32>
    %34 = tpu.matmul %33, %6, %cst_17 {dimension_numbers = #tpu.dot_dimension_numbers<[1], [0], [0], [1], [0, 0, 1, 1], [], []>} : vector<128x128xbf16>, vector<128x128xbf16>, vector<128x128xf32> -> vector<128x128xf32>
    %35 = arith.addf %34, %9 : vector<128x128xf32>
    %cst_18 = arith.constant 0.288987488 : f32
    %36 = vector.broadcast %cst_18 : f32 to vector<128x128xf32>
    %37 = arith.mulf %36, %12 : vector<128x128xf32>
    %cst_19 = arith.constant 0.685988069 : f32
    %38 = vector.broadcast %cst_19 : f32 to vector<128x128xf32>
    %39 = arith.mulf %38, %21 : vector<128x128xf32>
    %40 = arith.addf %37, %39 : vector<128x128xf32>
    %cst_20 = arith.constant 0.0250244588 : f32
    %41 = vector.broadcast %cst_20 : f32 to vector<128x128xf32>
    %42 = arith.mulf %41, %35 : vector<128x128xf32>
    %43 = arith.addf %40, %42 : vector<128x128xf32>
    %44 = arith.addf %0, %1 : vector<128x128xf32>
    %cst_21 = arith.constant 0.00999999977 : f32
    %45 = vector.broadcast %cst_21 : f32 to vector<128x128xf32>
    %46 = arith.mulf %43, %45 : vector<128x128xf32>
    %47 = arith.addf %44, %46 : vector<128x128xf32>
    %c0_22 = arith.constant 0 : index
    %c0_23 = arith.constant 0 : index
    %48 = vector.load %arg6[%c0_22, %c0_23] : memref<128x128xf32, #tpu.memory_space<vmem>>, vector<128x128xf32>
    tpu.vector_store %arg6[%c0_22, %c0_23], %47 {strides = array<i32>} : memref<128x128xf32, #tpu.memory_space<vmem>>, vector<128x128xf32>,
    %c0_24 = arith.constant 0 : index
    %c0_25 = arith.constant 0 : index
    %49 = vector.load %arg7[%c0_24, %c0_25] : memref<128x128xf32, #tpu.memory_space<vmem>>, vector<128x128xf32>
    tpu.vector_store %arg7[%c0_24, %c0_25], %12 {strides = array<i32>} : memref<128x128xf32, #tpu.memory_space<vmem>>, vector<128x128xf32>,
    return
  }
  func.func @transform_0(%arg0: i32) -> (i32, i32) {
    %c0_i32 = arith.constant 0 : i32
    %c0_i32_0 = arith.constant 0 : i32
    return %arg0, %c0_i32 : i32, i32
  }
  func.func @transform_1(%arg0: i32) -> (i32, i32) {
    %c0_i32 = arith.constant 0 : i32
    %c0_i32_0 = arith.constant 0 : i32
    return %arg0, %c0_i32 : i32, i32
  }
  func.func @transform_2(%arg0: i32) -> (i32, i32) {
    %c0_i32 = arith.constant 0 : i32
    %c0_i32_0 = arith.constant 0 : i32
    return %arg0, %c0_i32 : i32, i32
  }
  func.func @transform_3(%arg0: i32) -> (i32, i32) {
    %c0_i32 = arith.constant 0 : i32
    %c0_i32_0 = arith.constant 0 : i32
    %c0_i32_1 = arith.constant 0 : i32
    return %c0_i32, %c0_i32_0 : i32, i32
  }
  func.func @transform_4(%arg0: i32) -> (i32, i32) {
    %c0_i32 = arith.constant 0 : i32
    %c0_i32_0 = arith.constant 0 : i32
    %c0_i32_1 = arith.constant 0 : i32
    return %c0_i32, %c0_i32_0 : i32, i32
  }
  func.func @transform_5(%arg0: i32) -> (i32, i32) {
    %c0_i32 = arith.constant 0 : i32
    %c0_i32_0 = arith.constant 0 : i32
    return %arg0, %c0_i32 : i32, i32
  }
  func.func @transform_6(%arg0: i32) -> (i32, i32) {
    %c0_i32 = arith.constant 0 : i32
    %c0_i32_0 = arith.constant 0 : i32
    return %arg0, %c0_i32 : i32, i32
  }
}

</mosaic_0001>

<bundles_post_ra>
// kernel: tpu_custom_call.1
= control target key start
LH: loop header
LB: loop body
LE: loop exit
PB: predicated region body
PF: predicated region fallthrough
CT: control target
= control target key end

     0   :  { %s3013_s0 = inlined_call_operand.hbm [shape: f32[256,128], index: 0, kind: input, shape index: {}]   ;;  %s3014_s1 = inlined_call_operand.hbm [shape: f32[256,128], index: 1, kind: input, shape index: {}]   ;;  %s3015_s2 = inlined_call_operand.hbm [shape: f32[256,128], index: 2, kind: input, shape index: {}]   ;;  %s3016_s3 = inlined_call_operand.hbm [shape: bf16[128,128], index: 3, kind: input, shape index: {}]   ;;  %s3017_s4 = inlined_call_operand.vmem [shape: f32[1,128], index: 4, kind: input, shape index: {}]   ;;  %s3018_s5 = inlined_call_operand.hbm [shape: f32[256,128], index: 5, kind: output, shape index: {0}]   ;;  %s3019_s6 = inlined_call_operand.hbm [shape: f32[256,128], index: 6, kind: output, shape index: {1}]  }
   0x1   :  { %3073 = sst [smem:[#allocation57_spill]] %s3014_s1 }
   0x2   :  { %3074 = sst [smem:[#allocation58_spill]] %s3018_s5 }
   0x3   :  { %3075 = sst [smem:[#allocation59_spill]] %s3019_s6 }
   0x4   :  { %12 = vsyncpa [#allocation3], 0 }
   0x5   :  { %14 = vsyncpa [#allocation3 + $0x1], 0 }
   0x6   :  { %15 = vsyncpa [#allocation6], 0 }
   0x7   :  { %17 = vsyncpa [#allocation6 + $0x1], 0 }
   0x8   :  { %18 = vsyncpa [#allocation9], 0 }
   0x9   :  { %19 = vsyncpa [#allocation4], 0 }
   0xa   :  { %21 = vsyncpa [#allocation4 + $0x1], 0 }
   0xb   :  { %22 = vsyncpa [#allocation12], 0 }
   0xc   :  { %24 = vsyncpa [#allocation12 + $0x1], 0  ;;  %s1947_s21 = smov 0   ;;  %s1949_s22 = smov 0  }
   0xd   :  { %s1951_s23 = smov 0   ;;  %s1953_s24 = smov 0  }
   0xe LB: > { %3076 = sst [smem:[#allocation18_spill]] %s1886_s21  ;;  %s1968_s25 = sadd.s32 1, %s1898_s24   ;;  %s1898_s24 = sphi %s1953_s24, %s3181_s24   ;;  %s1894_s23 = sphi %s1951_s23, %s3185_s23   ;;  %s1890_s22 = sphi %s1949_s22, %s3184_s22   ;;  %s1886_s21 = sphi %s1947_s21, %s3183_s21  }
   0xf   : > { %3077 = sst [smem:[#allocation19_spill]] %s1898_s24  ;;  %s37_s26 = sadd.s32 1, %s1894_s23 }
  0x10   : > { %3078 = sst [smem:[#allocation20_spill]] %s1968_s25  ;;  %s34_s27 = ssub.s32 %s1898_s24, %s1968_s25 }
  0x11   : > { %p3020_p0 = scmp.ne.s32.totalorder %s1894_s23, %s1890_s22  ;;  %p35_p1 = scmp.eq.s32.totalorder %s34_s27, 0 }
  0x12   : > { %p45_p2 = scmp.eq.s32.totalorder %s1898_s24, 0  ;;  %p1612_p4 = scmp.lt.s32.totalorder %s1898_s24, 2 }
  0x13   : > { %s1979_s28 = scalar_select %p35_p1, %s1894_s23, %s37_s26  }
  0x14   : > { %p46_p5 = por %p45_p2, %p3020_p0  ;;  %s3025_s29 = sand.u32 1, %s1894_s23  }
  0x15   : > { %3079 = sst [smem:[#allocation21_spill]] %s1979_s28  ;;  %s1987_s30 = sshll.u32 %s3025_s29, 7 }
  0x16   : > { %s1990_s7 = sshll.u32 %s1898_s24, 11  ;;  %p1992_p6 = pnand %p1612_p4, %p46_p5 }
  0x17   : > { %s257_s9 = sand.u32 1, %s1898_s24   ;;  %s3081_s1 = sld [smem:[#allocation57_spill]] }
  0x18   : > { %s3080_s8 = scalar_select %p1992_p6, 1, 0 }
  0x19   : > { %s261_s13 = scalar_lea.vmem [#allocation5], %s1987_s30  ;;  %s2006_s15 = scalar_lea.sflag [#allocation6], %s257_s9 }
  0x1a   : > { %s268_s14 = sshll.u32 %s261_s13, 4  ;;  %p2012_p8 = pneg %p1992_p6  ;;  %s2004_s14 = int_to_ptr.vmem [resolvable:$true] %s268_s14 }
  0x1c   : > { %s3082_s17 = scalar_select %p2012_p8, 1, 0 }
  0x1d   : > { %s2001_s12 = scalar_lea.hbm %s3081_s1, %s1990_s7  ;;  %s1679_s20 = scalar_lea.hbm %s3081_s1, 4096 }
  0x1e   : > { %s1674_s16 = scalar_lea.hbm %s2001_s12, 2048  ;;  %p1680_p11 = scmp.lt.u32.totalorder %s2001_s12, %s3081_s1 }
  0x1f   : > { %p1675_p7 = scmp.ne.s32.totalorder %s2001_s12, %s1674_s16  ;;  %p1681_p12 = scmp.lt.u32.totalorder %s1679_s20, %s1674_s16 }
  0x20   : > { %p1683_p1 = scmp.lt.u32.totalorder %s1674_s16, %s2001_s12 }
  0x21   : > { %p1677_p9 = pnand %p2012_p8, %p1675_p7  ;;  %p1682_p13 = por %p1681_p12, %p1680_p11 }
  0x23   : > { %p1678_p10 = pneg %p1677_p9  ;;  %p1684_p2 = por %p1683_p1, %p1682_p13 }
  0x25   : > { %p1685_p4 = pnand %p1684_p2, %p1678_p10 }
  0x27   : > { %1688 = shalt.err (!%p1685_p4)
}
  0x28   : > { %s1689_s9 = scalar_lea.vmem %s2004_s14, 2048  ;;  %s1900_s10 = smov [#allocation5]  }
  0x29   : > { %p1690_p5 = scmp.ne.s32.totalorder %s2004_s14, %s1689_s9  ;;  %s1694_s11 = sshll.u32 %s1900_s10, 4  ;;  %s1695_s11 = int_to_ptr.vmem [resolvable:$false] %s1694_s11 }
  0x2a   : > { %s1696_s13 = scalar_lea.vmem %s1695_s11, 4096  ;;  %p1697_p3 = scmp.lt.s32.totalorder %s2004_s14, %s1695_s11 }
  0x2b   : > { %p1692_p7 = pnand %p1690_p5, %p2012_p8  ;;  %p1698_p0 = scmp.lt.s32.totalorder %s1696_s13, %s1689_s9 }
  0x2d   : > { %p1693_p9 = pneg %p1692_p7  ;;  %p1699_p11 = por %p1698_p0, %p1697_p3 }
  0x2f   : > { %p1700_p12 = pnand %p1699_p11, %p1693_p9 }
  0x31   : > { %1703 = shalt.err (!%p1700_p12)
}
  0x32   : > { %s3021_s16 = smov 128   ;;  %s3023_s18 = smov 8  }
  0x33   : > { %1600 = dma.hbm_to_vmem [thread:$0]  (!%p1992_p6), %s2001_s12, 2048, %s2004_s14, %s2006_s15, %s3021_s16, %s3021_s16, %s3023_s18  }
  0x34   : > { %s2040_s19 = sadd.s32 4294967295, %s1898_s24   ;;  %s1374_s20 = sadd.s32 4294967294, %s1898_s24  }
  0x35   : > { %p50_p0 = scmp.ne.s32.totalorder %s1890_s22, %s1886_s21  ;;  %p3031_p3 = scmp.eq.s32.totalorder %s2040_s19, 0 }
  0x36   : > { %p168_p10 = scmp.eq.s32.totalorder %s2040_s19, 1  ;;  %p174_p13 = scmp.eq.s32.totalorder %s1374_s20, 1 }
  0x37   : > { %p2049_p1 = por %p3031_p3, %p50_p0  ;;  %p1375_p2 = scmp.ge.s32.totalorder %s1898_s24, 1 }
  0x38   : > { %p3084_p4 = scmp.ne.s32.totalorder %s1894_s23, %s1890_s22  ;;  %p2061_p7 = por %p174_p13, %p50_p0 }
  0x39   : > { %s3083_s26 = scalar_select %p2049_p1, 1, 0 }
  0x3a   : > { %p2057_p5 = por %p168_p10, %p3084_p4  ;;  %p207_p9 = scmp.lt.s32.totalorder %s1898_s24, 3 }
  0x3b   : > { %s3086_s14 = scalar_select %p2061_p7, 1, 0 }
  0x3c   : > { %s3085_s12 = scalar_select %p2057_p5, 1, 0 }
  0x3d   : > { %3087 = sst [smem:[#allocation22_spill]] %s3086_s14  ;;  %p2066_p11 = pnand %p1375_p2, %p207_p9 }
  0x3e   : > { %s1903_s9 = smov [#allocation8]   ;;  %s2078_s20 = scalar_lea.hbm %s3013_s0, %s1990_s7 }
  0x3f   : > { %s3088_s27 = scalar_select %p2066_p11, 1, 0 }
  0x40   : > { %s219_s10 = sshll.u32 %s1903_s9, 4  ;;  %p1590_p12 = pneg %p2066_p11  ;;  %s2070_s10 = int_to_ptr.vmem [resolvable:$true] %s219_s10 }
  0x41   : > { %s240_s18 = scalar_lea.vmem [#allocation2], %s1987_s30  ;;  %s2093_s28 = scalar_lea.hbm %s3015_s2, %s1990_s7 }
  0x42   : > { %p2082_p0 = pnand %p1590_p12, %p3031_p3  ;;  %s247_s29 = sshll.u32 %s240_s18, 4  ;;  %s2087_s29 = int_to_ptr.vmem [resolvable:$true] %s247_s29 }
  0x43   : > { %s1704_s11 = scalar_lea.hbm %s3016_s3, 1024 }
  0x44   : > { %p1705_p10 = scmp.ne.s32.totalorder %s3016_s3, %s1704_s11  ;;  %p1706_p13 = pneg %p2082_p0 }
  0x45   : > { %p1711_p9 = scmp.lt.u32.totalorder %s1704_s11, %s3016_s3 }
  0x46   : > { %p1707_p2 = pnand %p1706_p13, %p1705_p10 }
  0x48   : > { %p1708_p4 = pneg %p1707_p2 }
  0x4a   : > { %p1713_p12 = pnand %p1711_p9, %p1708_p4 }
  0x4c   : > { %1716 = shalt.err (!%p1713_p12)
}
  0x4d   : > { %s1717_s1 = scalar_lea.vmem %s2070_s10, 1024  ;;  %p1725_p1 = scmp.lt.s32.totalorder %s2070_s10, %s2070_s10 }
  0x4e   : > { %p1718_p3 = scmp.ne.s32.totalorder %s2070_s10, %s1717_s1  ;;  %p1726_p11 = scmp.lt.s32.totalorder %s1717_s1, %s1717_s1 }
  0x50   : > { %p1720_p7 = pnand %p1718_p3, %p1706_p13  ;;  %p1727_p6 = por %p1726_p11, %p1725_p1 }
  0x52   : > { %p1721_p5 = pneg %p1720_p7 }
  0x54   : > { %p1728_p8 = pnand %p1727_p6, %p1721_p5 }
  0x56   : > { %1731 = shalt.err (!%p1728_p8)
}
  0x57   : > { %s1904_s24 = smov 64   ;;  %s1905_s21 = smov 4  }
  0x58   : > { %1593 = dma.hbm_to_vmem [thread:$0]  (!%p2082_p0), %s3016_s3, 1024, %s2070_s10, [#allocation9], %s1904_s24, %s1904_s24, %s1905_s21  }
  0x59   : > { %s3090_s14 = sand.u32 1, %s1894_s23   ;;  %s1732_s11 = scalar_lea.hbm %s2078_s20, 2048 }
  0x5a   : > { %s2118_s9 = scalar_lea.sflag [#allocation3], %s3090_s14  ;;  %p1733_p6 = scmp.ne.s32.totalorder %s2078_s20, %s1732_s11 }
  0x5b   : > { %p3091_p8 = scmp.ne.s32.totalorder %s3082_s17, 0  ;;  %s1737_s1 = scalar_lea.hbm %s3013_s0, 4096 }
  0x5c   : > { %p1738_p5 = scmp.lt.u32.totalorder %s2078_s20, %s3013_s0  ;;  %p1739_p7 = scmp.lt.u32.totalorder %s1737_s1, %s1732_s11 }
  0x5d   : > { %p1735_p3 = pnand %p1733_p6, %p3091_p8  ;;  %p1741_p10 = scmp.lt.u32.totalorder %s1732_s11, %s2078_s20 }
  0x5e   : > { %p1740_p11 = por %p1739_p7, %p1738_p5 }
  0x5f   : > { %p1736_p1 = pneg %p1735_p3 }
  0x60   : > { %p1742_p0 = por %p1741_p10, %p1740_p11 }
  0x62   : > { %p1743_p13 = pnand %p1742_p0, %p1736_p1 }
  0x64   : > { %1746 = shalt.err (!%p1743_p13)
}
  0x65   : > { %s1747_s16 = scalar_lea.vmem %s2087_s29, 2048  ;;  %s1906_s10 = smov [#allocation2]  }
  0x66   : > { %p1748_p2 = scmp.ne.s32.totalorder %s2087_s29, %s1747_s16  ;;  %s1752_s24 = sshll.u32 %s1906_s10, 4  ;;  %s1753_s24 = int_to_ptr.vmem [resolvable:$false] %s1752_s24 }
  0x67   : > { %s1754_s5 = scalar_lea.vmem %s1753_s24, 4096  ;;  %p1755_p12 = scmp.lt.s32.totalorder %s2087_s29, %s1753_s24 }
  0x68   : > { %p1750_p4 = pnand %p1748_p2, %p3091_p8  ;;  %p1756_p6 = scmp.lt.s32.totalorder %s1754_s5, %s1747_s16 }
  0x6a   : > { %p1751_p9 = pneg %p1750_p4  ;;  %p1757_p3 = por %p1756_p6, %p1755_p12 }
  0x6c   : > { %p1758_p5 = pnand %p1757_p3, %p1751_p9 }
  0x6e   : > { %1761 = shalt.err (!%p1758_p5)
}
  0x6f   : > { %p3092_p1 = scmp.ne.s32.totalorder %s3080_s8, 0  ;;  %s3093_s6 = smov 8  }
  0x70   : > { %s3094_s21 = smov 128   ;;  %s282_s25 = scalar_lea.vmem [#allocation7], %s1987_s30 }
  0x71   : > { %1597 = dma.hbm_to_vmem [thread:$0]  (!%p3092_p1), %s2078_s20, 2048, %s2087_s29, %s2118_s9, %s3094_s21, %s3094_s21, %s3093_s6  }
  0x72   : > { %s289_s7 = sshll.u32 %s282_s25, 4  ;;  %s1762_s14 = scalar_lea.hbm %s2093_s28, 2048  ;;  %s2146_s7 = int_to_ptr.vmem [resolvable:$true] %s289_s7 }
  0x73   : > { %p1763_p7 = scmp.ne.s32.totalorder %s2093_s28, %s1762_s14  ;;  %s1767_s18 = scalar_lea.hbm %s3015_s2, 4096 }
  0x74   : > { %p1768_p0 = scmp.lt.u32.totalorder %s2093_s28, %s3015_s2  ;;  %p1769_p13 = scmp.lt.u32.totalorder %s1767_s18, %s1762_s14 }
  0x75   : > { %p1765_p11 = pnand %p1763_p7, %p3091_p8  ;;  %p1771_p4 = scmp.lt.u32.totalorder %s1762_s14, %s2093_s28 }
  0x76   : > { %p1770_p2 = por %p1769_p13, %p1768_p0 }
  0x77   : > { %p1766_p10 = pneg %p1765_p11 }
  0x78   : > { %p1772_p9 = por %p1771_p4, %p1770_p2 }
  0x7a   : > { %p1773_p12 = pnand %p1772_p9, %p1766_p10 }
  0x7c   : > { %1776 = shalt.err (!%p1773_p12)
}
  0x7d   : > { %s1777_s29 = scalar_lea.vmem %s2146_s7, 2048  ;;  %s1907_s30 = smov [#allocation7]  }
  0x7e   : > { %p1778_p6 = scmp.ne.s32.totalorder %s2146_s7, %s1777_s29  ;;  %s1782_s20 = sshll.u32 %s1907_s30, 4  ;;  %s1783_s20 = int_to_ptr.vmem [resolvable:$false] %s1782_s20 }
  0x7f   : > { %s1784_s9 = scalar_lea.vmem %s1783_s20, 4096  ;;  %p1785_p7 = scmp.lt.s32.totalorder %s2146_s7, %s1783_s20 }
  0x80   : > { %p1780_p3 = pnand %p1778_p6, %p3091_p8  ;;  %p1786_p11 = scmp.lt.s32.totalorder %s1784_s9, %s1777_s29 }
  0x82   : > { %p1781_p5 = pneg %p1780_p3  ;;  %p1787_p0 = por %p1786_p11, %p1785_p7 }
  0x84   : > { %p1788_p13 = pnand %p1787_p0, %p1781_p5 }
  0x86   : > { %1791 = shalt.err (!%p1788_p13)
}
  0x87   : > { %1603 = dma.hbm_to_vmem [thread:$0]  (!%p3092_p1), %s2093_s28, 2048, %s2146_s7, %s2006_s15, %s3094_s21, %s3094_s21, %s3093_s6  }
  0x88   : > { %p3095_p8 = scmp.ne.s32.totalorder %s3088_s27, 0 }
  0x8a   : > { %301 = sbr.rel (%p3095_p8) target bundleno = 904 (0x388), region = 40 }
  0x91   : > { %s2176_s17 = sand.u32 1, %s1890_s22   ;;  %p3096_p10 = scmp.ne.s32.totalorder %s3083_s26, 0 }
  0x92   : > { %s2179_s10 = sshll.u32 %s2176_s17, 7  ;;  %s304_s8 = scalar_lea.sflag [#allocation3], %s2176_s17 }
  0x93   : > { %s2183_s24 = scalar_lea.vmem [#allocation2], %s2179_s10 }
  0x94   : > { %1865 = dma.done.wait (%p3096_p10), %s304_s8, 2048  }
  0x95   : > { %1867 = vsyncadd (%p3096_p10), %s304_s8, 4294965248  ;;  %s312_s28 = sand.u32 1, %s2040_s19   ;;  %s2191_s27 = scalar_lea.vmem [#allocation5], %s2179_s10 }
  0x96   : > { %s313_s15 = scalar_lea.sflag [#allocation6], %s312_s28 }
  0x97   : > { %1869 = dma.done.wait (%p3096_p10), %s313_s15, 4096  }
  0x98   : > { %1871 = vsyncadd (%p3096_p10), %s313_s15, 4294963200  ;;  %s2198_s5 = scalar_lea.vmem [#allocation7], %s2179_s10  ;;  %p3097_p1 = scmp.eq.s32.totalorder %s2040_s19, 0 }
  0x9a   : > { %1873 = dma.done.wait (%p3097_p1), [#allocation9], 1024   ;;  %p3098_p2 = pmov %p3097_p1 }
  0x9b   : > { %v2204_v0 = vld [vmem:[#allocation8] sm:$0xff]   ;;  %v2206_v1 = vld [vmem:[#allocation8 + $0x8] sm:$0xff]   ;;  %v2213_v2 = vld [vmem:[#allocation8 + $0x10] sm:$0xff]   ;;  %s2416_s21 = scalar_lea.vmem [#allocation11], %s2179_s10  ;;  %s1414_s25 = sshll.u32 %s2040_s19, 11 }
  0x9c   : > { %1875 = vsyncadd (%p3098_p2), [#allocation9], 4294966272  ;;  %1464 = vmatprep.subr.bf16.mxu0 %v2204_v0  ;;  %1496 = vmatprep.subr.bf16.mxu1 %v2204_v0  ;;  %v2219_v3 = vld [vmem:[#allocation8 + $0x18] sm:$0xff]   ;;  %v2222_v4 = vld [vmem:[%s2183_s24] sm:$0xff]  ;;  %s3153_s11 = sld [smem:[#allocation59_spill]]  ;;  %s1216_s18 = sshll.u32 %s2416_s21, 4  ;;  %s2846_s18 = int_to_ptr.vmem [resolvable:$true] %s1216_s18 }
  0x9d   : > { %1465 = vmatpush3.bf16.msra.mxu0 %v2204_v0  ;;  %1497 = vmatpush3.bf16.msra.mxu1 %v2204_v0  ;;  %3099 = vst [vmem:[#allocation23_spill] sm:$0xff] %v2222_v4  ;;  %v2225_v5 = vld [vmem:[%s2183_s24 + $0x8] sm:$0xff]  ;;  %v2232_v7 = vld [vmem:[#allocation8 + $0x20] sm:$0xff]   ;;  %v2244_v9 = vld [vmem:[#allocation8 + $0x30] sm:$0xff]   ;;  %s1187_s1 = scalar_lea.sflag [#allocation12], %s2176_s17  ;;  %s1792_s16 = scalar_lea.vmem %s2846_s18, 2048 }
  0x9e   : > { %1466 = vmatprep.subr.bf16.mxu0 %v2206_v1  ;;  %1498 = vmatprep.subr.bf16.mxu1 %v2206_v1  ;;  %3100 = vst [vmem:[#allocation24_spill] sm:$0xff] %v2225_v5  ;;  %v482_v6 = vpack.c.bf16 %v2225_v5, %v2222_v4  ;;  %v2238_v8 = vld [vmem:[#allocation8 + $0x28] sm:$0xff]   ;;  %v2250_v10 = vld [vmem:[#allocation8 + $0x38] sm:$0xff]   ;;  %v2256_v11 = vld [vmem:[%s2183_s24 + $0x10] sm:$0xff]  ;;  %p1793_p4 = scmp.ne.s32.totalorder %s2846_s18, %s1792_s16  ;;  %p3154_p9 = scmp.ne.s32.totalorder %s3085_s12, 0 }
  0x9f   : > { %3101 = vst [vmem:[#allocation25_spill] sm:$0xff] %v2256_v11  ;;  %v2259_v12 = vld [vmem:[%s2183_s24 + $0x18] sm:$0xff]  ;;  %v2263_v13 = vld [vmem:[%s2183_s24 + $0x20] sm:$0xff]  ;;  %v2266_v14 = vld [vmem:[%s2183_s24 + $0x28] sm:$0xff]  ;;  %s1908_s29 = smov [#allocation11]  }
  0xa0   : > { %1480 = vmatprep.mubr.bf16.mxu0 %v482_v6  ;;  %3102 = vst [vmem:[#allocation26_spill] sm:$0xff] %v2259_v12  ;;  %3103 = vst [vmem:[#allocation27_spill] sm:$0xff] %v2263_v13  ;;  %v483_v15 = vpack.c.bf16 %v2259_v12, %v2256_v11  ;;  %v484_v16 = vpack.c.bf16 %v2266_v14, %v2263_v13  ;;  %v2279_v17 = vld [vmem:[%s2183_s24 + $0x30] sm:$0xff]  ;;  %v2282_v18 = vld [vmem:[%s2183_s24 + $0x38] sm:$0xff]  ;;  %p1794_p12 = pnand %p1793_p4, %p3154_p9  ;;  %s1796_s30 = sshll.u32 %s1908_s29, 4  ;;  %s1797_s30 = int_to_ptr.vmem [resolvable:$false] %s1796_s30 }
  0xa1   : > { %1467 = vmatpush3.bf16.msra.mxu0 %v2206_v1  ;;  %1499 = vmatpush3.bf16.msra.mxu1 %v2206_v1  ;;  %3104 = vst [vmem:[#allocation28_spill] sm:$0xff] %v2266_v14  ;;  %3105 = vst [vmem:[#allocation29_spill] sm:$0xff] %v2279_v17  ;;  %v2286_v19 = vld [vmem:[%s2183_s24 + $0x40] sm:$0xff]  ;;  %v2289_v20 = vld [vmem:[%s2183_s24 + $0x48] sm:$0xff]  ;;  %v485_v21 = vpack.c.bf16 %v2282_v18, %v2279_v17  ;;  %s1798_s20 = scalar_lea.vmem %s1797_s30, 4096  ;;  %p1799_p3 = scmp.lt.s32.totalorder %s2846_s18, %s1797_s30 }
  0xa2   : > { %1468 = vmatprep.subr.bf16.mxu0 %v2213_v2  ;;  %1500 = vmatprep.subr.bf16.mxu1 %v2213_v2  ;;  %3106 = vst [vmem:[#allocation30_spill] sm:$0xff] %v2282_v18  ;;  %v486_v22 = vpack.c.bf16 %v2289_v20, %v2286_v19  ;;  %v2299_v23 = vld [vmem:[%s2183_s24 + $0x50] sm:$0xff]  ;;  %v2302_v24 = vld [vmem:[%s2183_s24 + $0x58] sm:$0xff]  ;;  %v2306_v25 = vld [vmem:[%s2183_s24 + $0x60] sm:$0xff]  ;;  %s2843_s13 = scalar_lea.hbm %s3153_s11, %s1414_s25  ;;  %p1795_p6 = pneg %p1794_p12 }
  0xa3   : > { %v2309_v26 = vld [vmem:[%s2183_s24 + $0x68] sm:$0xff]  ;;  %v487_v27 = vpack.c.bf16 %v2302_v24, %v2299_v23  ;;  %v2319_v29 = vld [vmem:[%s2183_s24 + $0x70] sm:$0xff]  ;;  %v2322_v30 = vld [vmem:[%s2183_s24 + $0x78] sm:$0xff]  ;;  %p1800_p5 = scmp.lt.s32.totalorder %s1798_s20, %s1792_s16 }
  0xa4   : > { %3107 = vst [vmem:[#allocation31_spill] sm:$0xff] %v2309_v26  ;;  %v488_v28 = vpack.c.bf16 %v2309_v26, %v2306_v25  ;;  %v489_v31 = vpack.c.bf16 %v2322_v30, %v2319_v29  ;;  %v2334_v32 = vld [vmem:[%s2191_s27 + $0x10] sm:$0xff]  ;;  %v2338_v34 = vld [vmem:[%s2191_s27] sm:$0xff]  ;;  %v2342_v36 = vld [vmem:[%s2191_s27 + $0x18] sm:$0xff] }
  0xa5   : > { %1469 = vmatpush3.bf16.msra.mxu0 %v2213_v2  ;;  %1501 = vmatpush3.bf16.msra.mxu1 %v2213_v2  ;;  %3108 = vst [vmem:[#allocation32_spill] sm:$0xff] %v2334_v32  ;;  %v413_v33 = vld [vmem:[%s2198_s5 + $0x10] sm:$0xff]  ;;  %3109 = vst [vmem:[#allocation33_spill] sm:$0xff] %v2338_v34  ;;  %v411_v35 = vld [vmem:[%s2198_s5] sm:$0xff]  ;;  %p1801_p7 = por %p1800_p5, %p1799_p3 }
  0xa6   : > { %1470 = vmatprep.subr.bf16.mxu0 %v2219_v3  ;;  %1502 = vmatprep.subr.bf16.mxu1 %v2219_v3  ;;  %3110 = vst [vmem:[#allocation34_spill] sm:$0xff] %v2342_v36  ;;  %v414_v37 = vld [vmem:[%s2198_s5 + $0x18] sm:$0xff]  ;;  %v2346_v38 = vld [vmem:[%s2191_s27 + $0x8] sm:$0xff]  ;;  %v429_v40 = vadd.f32 %v413_v33, %v2334_v32  ;;  %v427_v41 = vadd.f32 %v411_v35, %v2338_v34  ;;  %v2362_v48 = vld [vmem:[%s2191_s27 + $0x30] sm:$0xff] }
  0xa7   : > { %3111 = vst [vmem:[#allocation35_spill] sm:$0xff] %v2346_v38  ;;  %v412_v39 = vld [vmem:[%s2198_s5 + $0x8] sm:$0xff]  ;;  %v430_v42 = vadd.f32 %v414_v37, %v2342_v36  ;;  %3112 = vst [vmem:[#allocation36_spill] sm:$0xff] %v2362_v48  ;;  %v417_v49 = vld [vmem:[%s2198_s5 + $0x30] sm:$0xff]  ;;  %p1802_p11 = pnand %p1801_p7, %p1795_p6 }
  0xa8   : > { %v428_v43 = vadd.f32 %v412_v39, %v2346_v38  ;;  %v2353_v44 = vmul.f32 0.5, %v429_v40  ;;  %v2355_v45 = vmul.f32 0.5, %v427_v41  ;;  %v2367_v51 = vld [vmem:[%s2191_s27 + $0x20] sm:$0xff]  ;;  %v2370_v52 = vld [vmem:[%s2191_s27 + $0x38] sm:$0xff]  ;;  %v2375_v55 = vld [vmem:[%s2191_s27 + $0x28] sm:$0xff]  ;;  %v433_v60 = vadd.f32 %v417_v49, %v2362_v48 }
  0xa9   : > { %1471 = vmatpush3.bf16.msra.mxu0 %v2219_v3  ;;  %1503 = vmatpush3.bf16.msra.mxu1 %v2219_v3  ;;  %v2357_v46 = vmul.f32 0.5, %v430_v42  ;;  %3113 = vst [vmem:[#allocation37_spill] sm:$0xff] %v2367_v51  ;;  %3114 = vst [vmem:[#allocation38_spill] sm:$0xff] %v2370_v52  ;;  %v418_v53 = vld [vmem:[%s2198_s5 + $0x38] sm:$0xff]  ;;  %v415_v56 = vld [vmem:[%s2198_s5 + $0x20] sm:$0xff] }
  0xaa   : > { %1472 = vmatprep.subr.bf16.mxu0 %v2232_v7  ;;  %1504 = vmatprep.subr.bf16.mxu1 %v2232_v7  ;;  %v2359_v47 = vmul.f32 0.5, %v428_v43  ;;  %v637_v50 = vmul.f32 1.3371633, %v2353_v44  ;;  %v635_v54 = vmul.f32 1.3371633, %v2355_v45  ;;  %3115 = vst [vmem:[#allocation39_spill] sm:$0xff] %v2375_v55  ;;  %v434_v6 = vadd.f32 %v418_v53, %v2370_v52 }
  0xab   : > { %v416_v57 = vld [vmem:[%s2198_s5 + $0x28] sm:$0xff]  ;;  %v2382_v58 = vld [vmem:[%s3017_s4] ss:$0 sm:$0xff]  ;;  %v638_v59 = vmul.f32 1.3371633, %v2357_v46  ;;  %v2387_v61 = vld [vmem:[%s2191_s27 + $0x50] sm:$0xff] }
  0xac   : > { %3116 = vst [vmem:[#allocation40_spill] sm:$0xff] %v2387_v61  ;;  %v421_v62 = vld [vmem:[%s2198_s5 + $0x50] sm:$0xff]  ;;  %v636_v63 = vmul.f32 1.3371633, %v2359_v47  ;;  %v651_v33 = vadd.f32 %v635_v54, %v2222_v4  ;;  %v653_v35 = vadd.f32 %v637_v50, %v2256_v11  ;;  %v2408_v42 = vmul.f32 0.5, %v433_v60  ;;  %v2412_v49 = vld [vmem:[%s2191_s27 + $0x58] sm:$0xff] }
  0xad   : > { %1473 = vmatpush3.bf16.msra.mxu0 %v2232_v7  ;;  %1505 = vmatpush3.bf16.msra.mxu1 %v2232_v7  ;;  %v437_v37 = vadd.f32 %v421_v62, %v2387_v61  ;;  %v654_v41 = vadd.f32 %v638_v59, %v2259_v12  ;;  %3118 = vst [vmem:[#allocation42_spill] sm:$0xff] %v2412_v49  ;;  %v422_v53 = vld [vmem:[%s2198_s5 + $0x58] sm:$0xff]  ;;  %v2425_v59 = vmul.f32 0.5, %v434_v6  ;;  %v2428_v60 = vld [vmem:[%s2191_s27 + $0x48] sm:$0xff] }
  0xae   : > { %1474 = vmatprep.subr.bf16.mxu0 %v2238_v8  ;;  %1506 = vmatprep.subr.bf16.mxu1 %v2238_v8  ;;  %3119 = vst [vmem:[#allocation43_spill] sm:$0xff] %v2428_v60  ;;  %v420_v62 = vld [vmem:[%s2198_s5 + $0x48] sm:$0xff]  ;;  %v438_v6 = vadd.f32 %v422_v53, %v2412_v49  ;;  %v426_v34 = vld [vmem:[%s2198_s5 + $0x78] sm:$0xff] }
  0xb1   : > { %1475 = vmatpush3.bf16.msra.mxu0 %v2238_v8  ;;  %1507 = vmatpush3.bf16.msra.mxu1 %v2238_v8 }
  0xb2   : > { %1476 = vmatprep.subr.bf16.mxu0 %v2244_v9  ;;  %1508 = vmatprep.subr.bf16.mxu1 %v2244_v9 }
  0xb5   : > { %1477 = vmatpush3.bf16.msra.mxu0 %v2244_v9  ;;  %1509 = vmatpush3.bf16.msra.mxu1 %v2244_v9 }
  0xb6   : > { %1478 = vmatprep.subr.bf16.mxu0 %v2250_v10  ;;  %1510 = vmatprep.subr.bf16.mxu1 %v2250_v10 }
  0xb9   : > { %1479 = vmatpush3.bf16.msra.mxu0 %v2250_v10  ;;  %1511 = vmatpush3.bf16.msra.mxu1 %v2250_v10 }
  0xba   : > { %1528 = vmatprep.subr.bf16.mxu0 %v2204_v0  ;;  %1560 = vmatprep.subr.bf16.mxu1 %v2204_v0 }
  0xbc   : > { %1481 = vmatmul.mubr.bf16.vlgmr.msra.gmra.mrb[0].mxu0 %v483_v15  ;;  %v2393_v15 = vld [vmem:[%s2191_s27 + $0x40] sm:$0xff] }
  0xbd   : > { %1484 = vmatprep.mubr.bf16.mxu0 %v484_v16  ;;  %1529 = vmatpush3.bf16.msra.mxu0 %v2204_v0  ;;  %3117 = vst [vmem:[#allocation41_spill] sm:$0xff] %v2393_v15  ;;  %v419_v16 = vld [vmem:[%s2198_s5 + $0x40] sm:$0xff] }
  0xbe   : > { %1530 = vmatprep.subr.bf16.mxu0 %v2206_v1  ;;  %v435_v43 = vadd.f32 %v419_v16, %v2393_v15  ;;  %v2445_v15 = vmul.f32 0.5, %v437_v37 }
  0xc1   : > { %1531 = vmatpush3.bf16.msra.mxu0 %v2206_v1 }
  0xc2   : > { %1532 = vmatprep.subr.bf16.mxu0 %v2213_v2 }
  0xc4   : > { %1485 = vmatmul.mubr.bf16.gmra.mrb[4].mxu0 %v485_v21 }
  0xc5   : > { %1488 = vmatprep.mubr.bf16.mxu0 %v486_v22  ;;  %1533 = vmatpush3.bf16.msra.mxu0 %v2213_v2  ;;  %v431_v22 = vadd.f32 %v415_v56, %v2367_v51  ;;  %v652_v56 = vadd.f32 %v636_v63, %v2225_v5  ;;  %v642_v51 = vmul.f32 1.3371633, %v2425_v59 }
  0xc6   : > { %1534 = vmatprep.subr.bf16.mxu0 %v2219_v3 }
  0xc9   : > { %1535 = vmatpush3.bf16.msra.mxu0 %v2219_v3 }
  0xca   : > { %1536 = vmatprep.subr.bf16.mxu0 %v2232_v7 }
  0xcc   : > { %1489 = vmatmul.mubr.bf16.gmra.mrb[8].mxu0 %v487_v27  ;;  %v432_v27 = vadd.f32 %v416_v57, %v2375_v55  ;;  %v2451_v55 = vmul.f32 0.5, %v435_v43 }
  0xcd   : > { %1492 = vmatprep.mubr.bf16.mxu0 %v488_v28  ;;  %1537 = vmatpush3.bf16.msra.mxu0 %v2232_v7 }
  0xce   : > { %1538 = vmatprep.subr.bf16.mxu0 %v2238_v8  ;;  %3120 = vst [vmem:[#allocation44_spill] sm:$0xff] %v2451_v55 }
  0xd1   : > { %1539 = vmatpush3.bf16.msra.mxu0 %v2238_v8 }
  0xd2   : > { %1540 = vmatprep.subr.bf16.mxu0 %v2244_v9 }
  0xd4   : > { %1493 = vmatmul.mubr.bf16.gmra.mrb[12].mxu0 %v489_v31 }
  0xd5   : > { %1541 = vmatpush3.bf16.msra.mxu0 %v2244_v9 }
  0xd6   : > { %1542 = vmatprep.subr.bf16.mxu0 %v2250_v10 }
  0xd9   : > { %1543 = vmatpush3.bf16.msra.mxu0 %v2250_v10 }
 0x18f   : > { %v1482_v21 = vpop.f32.mrb[0].mxu0 }
 0x190   : > { %v2399_v28 = vadd.f32 %v1482_v21, %v2382_v58  ;;  %v572_v31 = vpop.f32.mrb[1].mxu0 }
 0x191   : > { %v2405_v39 = vadd.f32 %v2382_v58, %v572_v31  ;;  %v1483_v40 = vpop.f32.mrb[2].mxu0  ;;  %v2437_v31 = vmul.f32 0.5, %v431_v22 }
 0x192   : > { %1167 = vst [vmem:[%s2416_s21 + $0x10] sm:$0xff] %v2399_v28  ;;  %v2421_v50 = vadd.f32 %v1483_v40, %v2382_v58  ;;  %v575_v54 = vpop.f32.mrb[3].mxu0  ;;  %v669_v57 = vmul.f32 0.0069239624, %v2399_v28  ;;  %v2439_v40 = vmul.f32 0.5, %v432_v27 }
 0x193   : > { %1165 = vst [vmem:[%s2416_s21] sm:$0xff] %v2405_v39  ;;  %v2434_v16 = vadd.f32 %v2382_v58, %v575_v54  ;;  %v667_v21 = vmul.f32 0.0069239624, %v2405_v39  ;;  %v436_v54 = vadd.f32 %v420_v62, %v2428_v60  ;;  %v641_v27 = vmul.f32 1.3371633, %v2408_v42  ;;  %v2493_v60 = vld [vmem:[%s2191_s27 + $0x78] sm:$0xff] }
 0x194   : > { %1168 = vst [vmem:[%s2416_s21 + $0x18] sm:$0xff] %v2421_v50  ;;  %v670_v63 = vmul.f32 0.0069239624, %v2421_v50  ;;  %v685_v22 = vadd.f32 %v669_v57, %v653_v35  ;;  %v639_v37 = vmul.f32 1.3371633, %v2437_v31  ;;  %3125 = vst [vmem:[#allocation49_spill] sm:$0xff] %v2493_v60 }
 0x195   : > { %1166 = vst [vmem:[%s2416_s21 + $0x8] sm:$0xff] %v2434_v16  ;;  %v668_v61 = vmul.f32 0.0069239624, %v2434_v16  ;;  %v683_v38 = vadd.f32 %v667_v21, %v651_v33  ;;  %v640_v49 = vmul.f32 1.3371633, %v2439_v40 }
 0x196   : > { %v686_v52 = vadd.f32 %v670_v63, %v654_v41  ;;  %v2460_v41 = vmul.f32 0.5, %v438_v6  ;;  %v645_v57 = vmul.f32 1.3371633, %v2445_v15  ;;  %v657_v63 = vadd.f32 %v641_v27, %v2279_v17 }
 0x197   : > { %v1486_v48 = vpop.f32.mrb[4].mxu0  ;;  %v684_v53 = vadd.f32 %v668_v61, %v652_v56  ;;  %v2466_v56 = vmul.f32 0.5, %v436_v54  ;;  %v658_v6 = vadd.f32 %v642_v51, %v2282_v18  ;;  %v2478_v54 = vld [vmem:[%s2191_s27 + $0x70] sm:$0xff]  ;;  %v656_v27 = vadd.f32 %v640_v49, %v2266_v14  ;;  %v2500_v18 = vld [vmem:[%s2191_s27 + $0x68] sm:$0xff] }
 0x198   : > { %v2458_v36 = vadd.f32 %v1486_v48, %v2382_v58  ;;  %v588_v43 = vpop.f32.mrb[5].mxu0  ;;  %v700_v35 = vpack.c.bf16 %v686_v52, %v685_v22  ;;  %3121 = vst [vmem:[#allocation45_spill] sm:$0xff] %v2460_v41  ;;  %v643_v48 = vmul.f32 1.3371633, %v2451_v55  ;;  %3123 = vst [vmem:[#allocation47_spill] sm:$0xff] %v2478_v54  ;;  %v425_v22 = vld [vmem:[%s2198_s5 + $0x70] sm:$0xff]  ;;  %v442_v55 = vadd.f32 %v426_v34, %v2493_v60 }
 0x199   : > { %v2464_v62 = vadd.f32 %v2382_v58, %v588_v43  ;;  %v1487_v61 = vpop.f32.mrb[6].mxu0  ;;  %v699_v33 = vpack.c.bf16 %v684_v53, %v683_v38  ;;  %3122 = vst [vmem:[#allocation46_spill] sm:$0xff] %v2466_v56  ;;  %v655_v43 = vadd.f32 %v639_v37, %v2263_v13  ;;  %3126 = vst [vmem:[#allocation50_spill] sm:$0xff] %v2500_v18  ;;  %v644_v37 = vmul.f32 1.3371633, %v2466_v56 }
 0x19a   : > { %1171 = vst [vmem:[%s2416_s21 + $0x30] sm:$0xff] %v2458_v36  ;;  %v2472_v52 = vadd.f32 %v1487_v61, %v2382_v58  ;;  %v591_v21 = vpop.f32.mrb[7].mxu0  ;;  %v673_v38 = vmul.f32 0.0069239624, %v2458_v36  ;;  %v2490_v61 = vld [vmem:[%s2191_s27 + $0x60] sm:$0xff]  ;;  %v661_v34 = vadd.f32 %v645_v57, %v2299_v23 }
 0x19b   : > { %1169 = vst [vmem:[%s2416_s21 + $0x20] sm:$0xff] %v2464_v62  ;;  %v2484_v53 = vadd.f32 %v2382_v58, %v591_v21  ;;  %1512 = vmatprep.mubr.bf16.mxu1 %v699_v33  ;;  %v671_v51 = vmul.f32 0.0069239624, %v2464_v62  ;;  %3124 = vst [vmem:[#allocation48_spill] sm:$0xff] %v2490_v61  ;;  %v423_v21 = vld [vmem:[%s2198_s5 + $0x60] sm:$0xff]  ;;  %v424_v33 = vld [vmem:[%s2198_s5 + $0x68] sm:$0xff] }
 0x19c   : > { %1172 = vst [vmem:[%s2416_s21 + $0x38] sm:$0xff] %v2472_v52  ;;  %1513 = vmatmul.mubr.bf16.vlgmr.msra.gmra.mrb[0].mxu1 %v700_v35  ;;  %v674_v32 = vmul.f32 0.0069239624, %v2472_v52  ;;  %v646_v14 = vmul.f32 1.3371633, %v2460_v41  ;;  %v689_v17 = vadd.f32 %v673_v38, %v657_v63  ;;  %v441_v35 = vadd.f32 %v425_v22, %v2478_v54 }
 0x19d   : > { %1170 = vst [vmem:[%s2416_s21 + $0x28] sm:$0xff] %v2484_v53  ;;  %v672_v49 = vmul.f32 0.0069239624, %v2484_v53  ;;  %1568 = vmatpush3.bf16.msra.mxu1 %v2204_v0  ;;  %v687_v4 = vadd.f32 %v671_v51, %v655_v43  ;;  %v439_v11 = vadd.f32 %v423_v21, %v2490_v61  ;;  %v440_v56 = vadd.f32 %v424_v33, %v2500_v18  ;;  %v3132_v61 = vld [vmem:[#allocation25_spill] sm:$0xff] }
 0x19e   : > { %v690_v13 = vadd.f32 %v674_v32, %v658_v6  ;;  %1561 = vmatprep.subr.bf16.mxu1 %v2206_v1  ;;  %v659_v32 = vadd.f32 %v643_v48, %v2286_v19  ;;  %v660_v43 = vadd.f32 %v644_v37, %v2289_v20  ;;  %v2532_v57 = vmul.f32 0.5, %v441_v35 }
 0x19f   : > { %v1490_v5 = vpop.f32.mrb[8].mxu0  ;;  %v688_v12 = vadd.f32 %v672_v49, %v656_v27  ;;  %v662_v27 = vadd.f32 %v646_v14, %v2302_v24  ;;  %v2534_v48 = vmul.f32 0.5, %v442_v55  ;;  %v2545_v14 = vmul.f32 0.5, %v440_v56 }
 0x1a0   : > { %v2516_v41 = vadd.f32 %v1490_v5, %v2382_v58  ;;  %v604_v0 = vpop.f32.mrb[9].mxu0  ;;  %v702_v63 = vpack.c.bf16 %v690_v13, %v689_v17  ;;  %v649_v49 = vmul.f32 1.3371633, %v2532_v57  ;;  %v811_v18 = vmul.f32 3.3056452, %v2425_v59 }
 0x1a1   : > { %v2521_v6 = vadd.f32 %v2382_v58, %v604_v0  ;;  %v1491_v38 = vpop.f32.mrb[10].mxu0  ;;  %v701_v22 = vpack.c.bf16 %v688_v12, %v687_v4  ;;  %1569 = vmatpush3.bf16.msra.mxu1 %v2206_v1  ;;  %v2543_v12 = vmul.f32 0.5, %v439_v11  ;;  %v650_v11 = vmul.f32 1.3371633, %v2534_v48 }
 0x1a2   : > { %1175 = vst [vmem:[%s2416_s21 + $0x50] sm:$0xff] %v2516_v41  ;;  %v2529_v5 = vadd.f32 %v1491_v38, %v2382_v58  ;;  %v607_v13 = vpop.f32.mrb[11].mxu0  ;;  %v677_v17 = vmul.f32 0.0069239624, %v2516_v41  ;;  %1562 = vmatprep.subr.bf16.mxu1 %v2213_v2 }
 0x1a3   : > { %1173 = vst [vmem:[%s2416_s21 + $0x40] sm:$0xff] %v2521_v6  ;;  %v2540_v4 = vadd.f32 %v2382_v58, %v607_v13  ;;  %1516 = vmatprep.mubr.bf16.mxu1 %v701_v22  ;;  %v675_v1 = vmul.f32 0.0069239624, %v2521_v6  ;;  %v647_v0 = vmul.f32 1.3371633, %v2543_v12 }
 0x1a4   : > { %1176 = vst [vmem:[%s2416_s21 + $0x58] sm:$0xff] %v2529_v5  ;;  %1517 = vmatmul.mubr.bf16.gmra.mrb[4].mxu1 %v702_v63  ;;  %v678_v55 = vmul.f32 0.0069239624, %v2529_v5  ;;  %v693_v21 = vadd.f32 %v677_v17, %v661_v34  ;;  %v648_v63 = vmul.f32 1.3371633, %v2545_v14  ;;  %v665_v17 = vadd.f32 %v649_v49, %v2319_v29 }
 0x1a5   : > { %1174 = vst [vmem:[%s2416_s21 + $0x48] sm:$0xff] %v2540_v4  ;;  %v676_v51 = vmul.f32 0.0069239624, %v2540_v4  ;;  %1570 = vmatpush3.bf16.msra.mxu1 %v2213_v2  ;;  %v691_v37 = vadd.f32 %v675_v1, %v659_v32  ;;  %v666_v1 = vadd.f32 %v650_v11, %v2322_v30 }
 0x1a6   : > { %v694_v33 = vadd.f32 %v678_v55, %v662_v27  ;;  %1563 = vmatprep.subr.bf16.mxu1 %v2219_v3 }
 0x1a7   : > { %v1494_v56 = vpop.f32.mrb[12].mxu0  ;;  %v692_v35 = vadd.f32 %v676_v51, %v660_v43 }
 0x1a8   : > { %v2560_v38 = vadd.f32 %v1494_v56, %v2382_v58  ;;  %v620_v2 = vpop.f32.mrb[13].mxu0  ;;  %v704_v34 = vpack.c.bf16 %v694_v33, %v693_v21  ;;  %v664_v21 = vadd.f32 %v648_v63, %v2309_v26 }
 0x1a9   : > { %v2563_v22 = vadd.f32 %v2382_v58, %v620_v2  ;;  %v1495_v27 = vpop.f32.mrb[14].mxu0  ;;  %v703_v13 = vpack.c.bf16 %v692_v35, %v691_v37  ;;  %1571 = vmatpush3.bf16.msra.mxu1 %v2219_v3  ;;  %v663_v3 = vadd.f32 %v647_v0, %v2306_v25 }
 0x1aa   : > { %1179 = vst [vmem:[%s2416_s21 + $0x70] sm:$0xff] %v2560_v38  ;;  %v2569_v32 = vadd.f32 %v1495_v27, %v2382_v58  ;;  %v623_v43 = vpop.f32.mrb[15].mxu0  ;;  %v681_v55 = vmul.f32 0.0069239624, %v2560_v38  ;;  %1564 = vmatprep.subr.bf16.mxu1 %v2232_v7  ;;  %v2603_v27 = vmul.f32 -3.1609142, %v2405_v39 }
 0x1ab   : > { %1177 = vst [vmem:[%s2416_s21 + $0x60] sm:$0xff] %v2563_v22  ;;  %v2578_v51 = vadd.f32 %v2382_v58, %v623_v43  ;;  %1520 = vmatprep.mubr.bf16.mxu1 %v703_v13  ;;  %v679_v33 = vmul.f32 0.0069239624, %v2563_v22  ;;  %v2609_v13 = vmul.f32 -3.1609142, %v2421_v50 }
 0x1ac   : > { %1180 = vst [vmem:[%s2416_s21 + $0x78] sm:$0xff] %v2569_v32  ;;  %1521 = vmatmul.mubr.bf16.gmra.mrb[8].mxu1 %v704_v34  ;;  %v682_v49 = vmul.f32 0.0069239624, %v2569_v32  ;;  %v697_v56 = vadd.f32 %v681_v55, %v665_v17  ;;  %v2600_v34 = vmul.f32 0.2889875, %v2399_v28 }
 0x1ad   : > { %1178 = vst [vmem:[%s2416_s21 + $0x68] sm:$0xff] %v2578_v51  ;;  %v680_v11 = vmul.f32 0.0069239624, %v2578_v51  ;;  %1572 = vmatpush3.bf16.msra.mxu1 %v2232_v7  ;;  %v695_v35 = vadd.f32 %v679_v33, %v663_v3  ;;  %v2597_v7 = vmul.f32 -3.1609142, %v2399_v28 }
 0x1ae   : > { %v698_v37 = vadd.f32 %v682_v49, %v666_v1  ;;  %1565 = vmatprep.subr.bf16.mxu1 %v2238_v8  ;;  %v2618_v43 = vmul.f32 0.2889875, %v2434_v16  ;;  %v2621_v28 = vmul.f32 -3.1609142, %v2458_v36  ;;  %v2624_v17 = vmul.f32 0.2889875, %v2458_v36 }
 0x1af   : > { %v696_v0 = vadd.f32 %v680_v11, %v664_v21  ;;  %v2630_v1 = vmul.f32 0.2889875, %v2464_v62  ;;  %v2636_v55 = vmul.f32 0.2889875, %v2472_v52  ;;  %v2642_v3 = vmul.f32 0.2889875, %v2484_v53 }
 0x1b0   : > { %v706_v63 = vpack.c.bf16 %v698_v37, %v697_v56  ;;  %v2645_v36 = vmul.f32 -3.1609142, %v2516_v41  ;;  %v2648_v21 = vmul.f32 0.2889875, %v2516_v41  ;;  %v2654_v33 = vmul.f32 0.2889875, %v2521_v6 }
 0x1b1   : > { %v705_v2 = vpack.c.bf16 %v696_v0, %v695_v35  ;;  %1573 = vmatpush3.bf16.msra.mxu1 %v2238_v8  ;;  %v2606_v8 = vmul.f32 0.2889875, %v2405_v39  ;;  %v2627_v39 = vmul.f32 -3.1609142, %v2464_v62  ;;  %v2651_v62 = vmul.f32 -3.1609142, %v2521_v6 }
 0x1b2   : > { %1566 = vmatprep.subr.bf16.mxu1 %v2244_v9  ;;  %v2660_v49 = vmul.f32 0.2889875, %v2529_v5  ;;  %v2666_v11 = vmul.f32 0.2889875, %v2540_v4  ;;  %v2669_v41 = vmul.f32 -3.1609142, %v2560_v38 }
 0x1b3   : > { %1524 = vmatprep.mubr.bf16.mxu1 %v705_v2  ;;  %v2672_v56 = vmul.f32 0.2889875, %v2560_v38  ;;  %v2675_v6 = vmul.f32 -3.1609142, %v2563_v22  ;;  %v806_v37 = vmul.f32 3.3056452, %v2353_v44 }
 0x1b4   : > { %1525 = vmatmul.mubr.bf16.gmra.mrb[12].mxu1 %v706_v63  ;;  %v2682_v35 = vmul.f32 -3.1609142, %v2569_v32  ;;  %v804_v0 = vmul.f32 3.3056452, %v2355_v45  ;;  %v805_v63 = vmul.f32 3.3056452, %v2359_v47 }
 0x1b5   : > { %1574 = vmatpush3.bf16.msra.mxu1 %v2244_v9  ;;  %v2612_v9 = vmul.f32 0.2889875, %v2421_v50  ;;  %v2633_v50 = vmul.f32 -3.1609142, %v2472_v52  ;;  %v2657_v52 = vmul.f32 -3.1609142, %v2529_v5  ;;  %v822_v54 = vadd.f32 %v806_v37, %v3132_v61 }
 0x1b6   : > { %1567 = vmatprep.subr.bf16.mxu1 %v2250_v10  ;;  %3127 = vst [vmem:[#allocation51_spill] sm:$0xff] %v2672_v56  ;;  %3128 = vst [vmem:[#allocation52_spill] sm:$0xff] %v2675_v6  ;;  %v2679_v5 = vmul.f32 0.2889875, %v2563_v22  ;;  %v808_v38 = vmul.f32 3.3056452, %v2437_v31 }
 0x1b7   : > { %3130 = vst [vmem:[#allocation54_spill] sm:$0xff] %v2682_v35  ;;  %v810_v2 = vmul.f32 3.3056452, %v2408_v42  ;;  %v814_v44 = vmul.f32 3.3056452, %v2445_v15  ;;  %v3136_v31 = vld [vmem:[#allocation26_spill] sm:$0xff] }
 0x1b8   : > { %3129 = vst [vmem:[#allocation53_spill] sm:$0xff] %v2679_v5  ;;  %v809_v22 = vmul.f32 3.3056452, %v2439_v40  ;;  %v2693_v60 = vmul.f32 0.2889875, %v2569_v32  ;;  %v3137_v35 = vld [vmem:[#allocation23_spill] sm:$0xff] }
 0x1b9   : > { %1575 = vmatpush3.bf16.msra.mxu1 %v2250_v10  ;;  %v2615_v10 = vmul.f32 -3.1609142, %v2434_v16  ;;  %v2639_v16 = vmul.f32 -3.1609142, %v2484_v53  ;;  %v2663_v53 = vmul.f32 -3.1609142, %v2540_v4  ;;  %v820_v15 = vadd.f32 %v804_v0, %v3137_v35 }
 0x1ba   : > { %v807_v4 = vmul.f32 3.3056452, %v2357_v46  ;;  %3131 = vst [vmem:[#allocation55_spill] sm:$0xff] %v2693_v60  ;;  %v3133_v46 = vld [vmem:[#allocation45_spill] sm:$0xff]  ;;  %v2698_v45 = vmul.f32 -3.1609142, %v2578_v51  ;;  %v2719_v35 = vadd.f32 %v814_v44, %v2299_v23 }
 0x1bb   : > { %v815_v26 = vmul.f32 3.3056452, %v3133_v46  ;;  %v2701_v47 = vmul.f32 0.2889875, %v2578_v51  ;;  %v3138_v5 = vld [vmem:[#allocation24_spill] sm:$0xff]  ;;  %v3140_v61 = vld [vmem:[#allocation27_spill] sm:$0xff] }
 0x1bc   : > { %3134 = vst [vmem:[#allocation45_spill] sm:$0xff] %v2698_v45  ;;  %v823_v59 = vadd.f32 %v807_v4, %v3136_v31  ;;  %v821_v40 = vadd.f32 %v805_v63, %v3138_v5  ;;  %v3139_v6 = vld [vmem:[#allocation44_spill] sm:$0xff]  ;;  %v2709_v46 = vadd.f32 %v808_v38, %v3140_v61  ;;  %v3141_v56 = vld [vmem:[#allocation29_spill] sm:$0xff]  ;;  %v3142_v51 = vld [vmem:[#allocation30_spill] sm:$0xff] }
 0x1bd   : > { %3135 = vst [vmem:[#allocation56_spill] sm:$0xff] %v2701_v47  ;;  %v812_v32 = vmul.f32 3.3056452, %v3139_v6  ;;  %v2712_v45 = vadd.f32 %v810_v2, %v3141_v56  ;;  %v2715_v47 = vadd.f32 %v811_v18, %v3142_v51  ;;  %v3143_v5 = vld [vmem:[#allocation28_spill] sm:$0xff]  ;;  %v3144_v0 = vld [vmem:[#allocation46_spill] sm:$0xff]  ;;  %v2727_v56 = vadd.f32 %v815_v26, %v2302_v24 }
 0x1be   : > { %v2722_v6 = vadd.f32 %v809_v22, %v3143_v5  ;;  %v813_v63 = vmul.f32 3.3056452, %v3144_v0 }
 0x1bf   : > { %v2731_v23 = vadd.f32 %v812_v32, %v2286_v19 }
 0x26f   : > { %v1514_v42 = vpop.f32.mrb[0].mxu1 }
 0x270   : > { %v750_v60 = vadd.f32 %v1514_v42, %v2382_v58  ;;  %v741_v37 = vpop.f32.mrb[1].mxu1 }
 0x271   : > { %v742_v4 = vadd.f32 %v2382_v58, %v741_v37  ;;  %v1515_v31 = vpop.f32.mrb[2].mxu1 }
 0x272   : > { %v854_v42 = vmul.f32 4.1609144, %v750_v60  ;;  %v1039_v61 = vmul.f32 0.68598807, %v750_v60  ;;  %v753_v38 = vadd.f32 %v1515_v31, %v2382_v58  ;;  %v744_v2 = vpop.f32.mrb[3].mxu1 }
 0x273   : > { %v852_v18 = vmul.f32 4.1609144, %v742_v4  ;;  %v1037_v51 = vmul.f32 0.68598807, %v742_v4  ;;  %v745_v37 = vadd.f32 %v2382_v58, %v744_v2 }
 0x274   : > { %v870_v44 = vadd.f32 %v854_v42, %v2597_v7  ;;  %v2735_v22 = vadd.f32 %v1039_v61, %v2600_v34  ;;  %v855_v5 = vmul.f32 4.1609144, %v753_v38  ;;  %v1040_v60 = vmul.f32 0.68598807, %v753_v38 }
 0x275   : > { %v868_v31 = vadd.f32 %v852_v18, %v2603_v27  ;;  %v2739_v0 = vadd.f32 %v1037_v51, %v2606_v8  ;;  %v853_v24 = vmul.f32 4.1609144, %v745_v37  ;;  %v1038_v26 = vmul.f32 0.68598807, %v745_v37 }
 0x276   : > { %v886_v4 = vmul.f32 0.01, %v870_v44  ;;  %v871_v2 = vadd.f32 %v855_v5, %v2609_v13  ;;  %v2743_v19 = vadd.f32 %v1040_v60, %v2612_v9  ;;  %v818_v7 = vmul.f32 3.3056452, %v2532_v57 }
 0x277   : > { %v884_v32 = vmul.f32 0.01, %v868_v31  ;;  %v869_v34 = vadd.f32 %v853_v24, %v2615_v10  ;;  %v2748_v42 = vadd.f32 %v1038_v26, %v2618_v43  ;;  %v1518_v27 = vpop.f32.mrb[4].mxu1  ;;  %v2751_v8 = vmul.f32 3.3056452, %v2543_v12 }
 0x278   : > { %v887_v51 = vmul.f32 0.01, %v871_v2  ;;  %v766_v61 = vadd.f32 %v1518_v27, %v2382_v58  ;;  %v757_v38 = vpop.f32.mrb[5].mxu1  ;;  %v2755_v13 = vadd.f32 %v813_v63, %v2289_v20  ;;  %v2758_v9 = vmul.f32 3.3056452, %v2545_v14 }
 0x279   : > { %v902_v57 = vadd.f32 %v886_v4, %v822_v54  ;;  %v885_v18 = vmul.f32 0.01, %v869_v34  ;;  %v758_v10 = vadd.f32 %v2382_v58, %v757_v38  ;;  %v1519_v43 = vpop.f32.mrb[6].mxu1  ;;  %v900_v37 = vadd.f32 %v884_v32, %v820_v15 }
 0x27a   : > { %v903_v44 = vadd.f32 %v887_v51, %v823_v59  ;;  %v858_v5 = vmul.f32 4.1609144, %v766_v61  ;;  %v1043_v12 = vmul.f32 0.68598807, %v766_v61  ;;  %v769_v60 = vadd.f32 %v1519_v43, %v2382_v58  ;;  %v760_v31 = vpop.f32.mrb[7].mxu1 }
 0x27b   : > { %v856_v24 = vmul.f32 4.1609144, %v758_v10  ;;  %v1041_v26 = vmul.f32 0.68598807, %v758_v10  ;;  %v761_v20 = vadd.f32 %v2382_v58, %v760_v31  ;;  %v901_v63 = vadd.f32 %v885_v18, %v821_v40 }
 0x27c   : > { %v917_v2 = vpack.c.bf16 %v903_v44, %v902_v57  ;;  %v874_v14 = vadd.f32 %v858_v5, %v2621_v28  ;;  %v2765_v54 = vadd.f32 %v1043_v12, %v2624_v17  ;;  %v859_v4 = vmul.f32 4.1609144, %v769_v60 }
 0x27d   : > { %v872_v15 = vadd.f32 %v856_v24, %v2627_v39  ;;  %v2769_v59 = vadd.f32 %v1041_v26, %v2630_v1  ;;  %v1044_v32 = vmul.f32 0.68598807, %v769_v60  ;;  %v857_v34 = vmul.f32 4.1609144, %v761_v20 }
 0x27e   : > { %v890_v27 = vmul.f32 0.01, %v874_v14  ;;  %v875_v51 = vadd.f32 %v859_v4, %v2633_v50  ;;  %v1042_v61 = vmul.f32 0.68598807, %v761_v20  ;;  %v916_v38 = vpack.c.bf16 %v901_v63, %v900_v37 }
 0x27f   : > { %v888_v40 = vmul.f32 0.01, %v872_v15  ;;  %v2773_v57 = vadd.f32 %v1044_v32, %v2636_v55  ;;  %v873_v28 = vadd.f32 %v857_v34, %v2639_v16  ;;  %v1522_v17 = vpop.f32.mrb[8].mxu1  ;;  %v819_v18 = vmul.f32 3.3056452, %v2534_v48 }
 0x280   : > { %v891_v39 = vmul.f32 0.01, %v875_v51  ;;  %v2778_v1 = vadd.f32 %v1042_v61, %v2642_v3  ;;  %v782_v10 = vadd.f32 %v1522_v17, %v2382_v58  ;;  %1544 = vmatprep.mubr.bf16.mxu0 %v916_v38  ;;  %v773_v43 = vpop.f32.mrb[9].mxu1  ;;  %v2782_v50 = vadd.f32 %v818_v7, %v2319_v29 }
 0x281   : > { %v889_v37 = vmul.f32 0.01, %v873_v28  ;;  %v774_v55 = vadd.f32 %v2382_v58, %v773_v43  ;;  %1545 = vmatmul.mubr.bf16.vlgmr.msra.gmra.mrb[16].mxu0 %v917_v2  ;;  %v1523_v44 = vpop.f32.mrb[10].mxu1  ;;  %v904_v16 = vadd.f32 %v888_v40, %v2709_v46  ;;  %v906_v48 = vadd.f32 %v890_v27, %v2712_v45 }
 0x282   : > { %v862_v5 = vmul.f32 4.1609144, %v782_v10  ;;  %v1047_v12 = vmul.f32 0.68598807, %v782_v10  ;;  %v785_v3 = vadd.f32 %v1523_v44, %v2382_v58  ;;  %v776_v60 = vpop.f32.mrb[11].mxu1  ;;  %v907_v31 = vadd.f32 %v891_v39, %v2715_v47 }
 0x283   : > { %v860_v24 = vmul.f32 4.1609144, %v774_v55  ;;  %v1045_v26 = vmul.f32 0.68598807, %v774_v55  ;;  %v777_v29 = vadd.f32 %v2382_v58, %v776_v60  ;;  %v905_v7 = vadd.f32 %v889_v37, %v2722_v6 }
 0x284   : > { %v878_v20 = vadd.f32 %v862_v5, %v2645_v36  ;;  %v2793_v63 = vadd.f32 %v1047_v12, %v2648_v21  ;;  %v863_v46 = vmul.f32 4.1609144, %v785_v3  ;;  %v1048_v45 = vmul.f32 0.68598807, %v785_v3  ;;  %v3146_v5 = vld [vmem:[#allocation52_spill] sm:$0xff]  ;;  %v3147_v12 = vld [vmem:[#allocation53_spill] sm:$0xff] }
 0x285   : > { %v876_v2 = vadd.f32 %v860_v24, %v2651_v62  ;;  %v2797_v14 = vadd.f32 %v1045_v26, %v2654_v33  ;;  %v861_v4 = vmul.f32 4.1609144, %v777_v29  ;;  %v1046_v47 = vmul.f32 0.68598807, %v777_v29  ;;  %v3148_v26 = vld [vmem:[#allocation54_spill] sm:$0xff] }
 0x286   : > { %v894_v15 = vmul.f32 0.01, %v878_v20  ;;  %v879_v32 = vadd.f32 %v863_v46, %v2657_v52  ;;  %v2801_v34 = vadd.f32 %v1048_v45, %v2660_v49  ;;  %v918_v6 = vpack.c.bf16 %v905_v7, %v904_v16  ;;  %v3145_v16 = vld [vmem:[#allocation51_spill] sm:$0xff] }
 0x287   : > { %v892_v36 = vmul.f32 0.01, %v876_v2  ;;  %v877_v21 = vadd.f32 %v861_v4, %v2663_v53  ;;  %v2805_v27 = vadd.f32 %v1046_v47, %v2666_v11  ;;  %v1526_v51 = vpop.f32.mrb[12].mxu1  ;;  %v919_v62 = vpack.c.bf16 %v907_v31, %v906_v48  ;;  %v3149_v46 = vld [vmem:[#allocation55_spill] sm:$0xff] }
 0x288   : > { %v895_v61 = vmul.f32 0.01, %v879_v32  ;;  %v798_v33 = vadd.f32 %v1526_v51, %v2382_v58  ;;  %1548 = vmatprep.mubr.bf16.mxu0 %v918_v6  ;;  %v789_v38 = vpop.f32.mrb[13].mxu1  ;;  %v832_v52 = vadd.f32 %v2751_v8, %v2306_v25  ;;  %v835_v49 = vadd.f32 %v819_v18, %v2322_v30  ;;  %v3151_v4 = vld [vmem:[#allocation31_spill] sm:$0xff]  ;;  %v3152_v32 = vld [vmem:[#allocation56_spill] sm:$0xff] }
 0x289   : > { %v910_v40 = vadd.f32 %v894_v15, %v2719_v35  ;;  %v893_v28 = vmul.f32 0.01, %v877_v21  ;;  %v790_v53 = vadd.f32 %v2382_v58, %v789_v38  ;;  %1549 = vmatmul.mubr.bf16.gmra.mrb[20].mxu0 %v919_v62  ;;  %v1527_v11 = vpop.f32.mrb[14].mxu1  ;;  %v908_v17 = vadd.f32 %v892_v36, %v2731_v23 }
 0x28a   : > { %v911_v39 = vadd.f32 %v895_v61, %v2727_v56  ;;  %v866_v10 = vmul.f32 4.1609144, %v798_v33  ;;  %v1051_v43 = vmul.f32 0.68598807, %v798_v33  ;;  %v801_v37 = vadd.f32 %v1527_v11, %v2382_v58  ;;  %v792_v55 = vpop.f32.mrb[15].mxu1 }
 0x28b   : > { %v864_v44 = vmul.f32 4.1609144, %v790_v53  ;;  %v1049_v25 = vmul.f32 0.68598807, %v790_v53  ;;  %v793_v30 = vadd.f32 %v2382_v58, %v792_v55  ;;  %v909_v35 = vadd.f32 %v893_v28, %v2755_v13 }
 0x28c   : > { %v921_v8 = vpack.c.bf16 %v911_v39, %v910_v40  ;;  %v882_v18 = vadd.f32 %v866_v10, %v2669_v41  ;;  %v2820_v48 = vadd.f32 %v1051_v43, %v3145_v16  ;;  %v867_v23 = vmul.f32 4.1609144, %v801_v37  ;;  %v3150_v41 = vld [vmem:[#allocation45_spill] sm:$0xff] }
 0x28d   : > { %v880_v56 = vadd.f32 %v864_v44, %v3146_v5  ;;  %v2824_v3 = vadd.f32 %v1049_v25, %v3147_v12  ;;  %v1052_v60 = vmul.f32 0.68598807, %v801_v37  ;;  %v865_v31 = vmul.f32 4.1609144, %v793_v30 }
 0x28e   : > { %v898_v24 = vmul.f32 0.01, %v882_v18  ;;  %v883_v29 = vadd.f32 %v867_v23, %v3148_v26  ;;  %v1050_v7 = vmul.f32 0.68598807, %v793_v30  ;;  %v920_v20 = vpack.c.bf16 %v909_v35, %v908_v17 }
 0x28f   : > { %v896_v13 = vmul.f32 0.01, %v880_v56  ;;  %v2828_v45 = vadd.f32 %v1052_v60, %v3149_v46  ;;  %v881_v2 = vadd.f32 %v865_v31, %v3150_v41  ;;  %v833_v47 = vadd.f32 %v2758_v9, %v3151_v4 }
 0x290   : > { %v899_v15 = vmul.f32 0.01, %v883_v29  ;;  %v2834_v6 = vadd.f32 %v1050_v7, %v3152_v32  ;;  %1552 = vmatprep.mubr.bf16.mxu1 %v920_v20  ;;  %v914_v21 = vadd.f32 %v898_v24, %v2782_v50 }
 0x291   : > { %v897_v36 = vmul.f32 0.01, %v881_v2  ;;  %1553 = vmatmul.mubr.bf16.vlgmr.msra.gmra.mrb[16].mxu1 %v921_v8  ;;  %v912_v62 = vadd.f32 %v896_v13, %v832_v52 }
 0x292   : > { %v915_v51 = vadd.f32 %v899_v15, %v835_v49 }
 0x293   : > { %v913_v61 = vadd.f32 %v897_v36, %v833_v47 }
 0x294   : > { %v923_v33 = vpack.c.bf16 %v915_v51, %v914_v21 }
 0x295   : > { %v922_v38 = vpack.c.bf16 %v913_v61, %v912_v62 }
 0x297   : > { %1556 = vmatprep.mubr.bf16.mxu1 %v922_v38 }
 0x299   : > { %1557 = vmatmul.mubr.bf16.gmra.mrb[20].mxu1 %v923_v33 }
 0x29a   : > { %1805 = shalt.err (!%p1802_p11)
}
 0x29b   : > { %s1806_s9 = scalar_lea.hbm %s2843_s13, 2048  ;;  %s1810_s15 = scalar_lea.hbm %s3153_s11, 4096 }
 0x29c   : > { %p1807_p0 = scmp.ne.s32.totalorder %s2843_s13, %s1806_s9  ;;  %p1811_p10 = scmp.lt.u32.totalorder %s2843_s13, %s3153_s11 }
 0x29d   : > { %p1812_p1 = scmp.lt.u32.totalorder %s1810_s15, %s1806_s9  ;;  %p1814_p4 = scmp.lt.u32.totalorder %s1806_s9, %s2843_s13 }
 0x29e   : > { %p1808_p13 = pnand %p1807_p0, %p3154_p9 }
 0x29f   : > { %p1813_p2 = por %p1812_p1, %p1811_p10 }
 0x2a0   : > { %p1809_p8 = pneg %p1808_p13 }
 0x2a1   : > { %p1815_p12 = por %p1814_p4, %p1813_p2 }
 0x2a3   : > { %p1816_p6 = pnand %p1815_p12, %p1809_p8 }
 0x2a5   : > { %1819 = shalt.err (!%p1816_p6)
}
 0x2a6   : > { %s1909_s26 = smov 128   ;;  %s1910_s6 = smov 8   ;;  %v3155_v43 = vld [vmem:[#allocation25_spill] sm:$0xff]  ;;  %v3156_v37 = vld [vmem:[#allocation32_spill] sm:$0xff]  ;;  %v1662_v30 = vld [vmem:[%s2183_s24] sm:$0xff] }
 0x2a7   : > { %1587 = dma.vmem_to_hbm [thread:$0]  (%p3154_p9), %s2846_s18, 2048, %s2843_s13, %s1187_s1, %s1909_s26, %s1909_s26, %s1910_s6   ;;  %v1103_v55 = vadd.f32 %v3156_v37, %v3155_v43  ;;  %v3157_v35 = vld [vmem:[#allocation33_spill] sm:$0xff]  ;;  %v3158_v5 = vld [vmem:[#allocation26_spill] sm:$0xff]  ;;  %v3160_v24 = vld [vmem:[#allocation35_spill] sm:$0xff] }
 0x2a8   : > { %v1101_v8 = vadd.f32 %v1662_v30, %v3157_v35  ;;  %v3159_v56 = vld [vmem:[#allocation34_spill] sm:$0xff]  ;;  %v1663_v31 = vld [vmem:[%s2183_s24 + $0x8] sm:$0xff]  ;;  %s2894_s21 = scalar_lea.vmem [#allocation10], %s2179_s10  ;;  %v3161_v62 = vld [vmem:[#allocation29_spill] sm:$0xff]  ;;  %s3175_s13 = sld [smem:[#allocation58_spill]] }
 0x2a9   : > { %v1104_v12 = vadd.f32 %v3159_v56, %v3158_v5  ;;  %v1102_v26 = vadd.f32 %v1663_v31, %v3160_v24  ;;  %v3162_v61 = vld [vmem:[#allocation36_spill] sm:$0xff]  ;;  %v3166_v37 = vld [vmem:[#allocation39_spill] sm:$0xff]  ;;  %v1666_v24 = vld [vmem:[%s2183_s24 + $0x50] sm:$0xff]  ;;  %s1200_s10 = sshll.u32 %s2894_s21, 4  ;;  %s1911_s16 = smov [#allocation10]   ;;  %s2964_s10 = int_to_ptr.vmem [resolvable:$true] %s1200_s10 }
 0x2aa   : > { %v1107_v33 = vadd.f32 %v3162_v61, %v3161_v62  ;;  %v1665_v43 = vld [vmem:[%s2183_s24 + $0x28] sm:$0xff]  ;;  %s1820_s1 = scalar_lea.vmem %s2964_s10, 2048  ;;  %s1824_s19 = sshll.u32 %s1911_s16, 4  ;;  %s1825_s19 = int_to_ptr.vmem [resolvable:$false] %s1824_s19 }
 0x2ab   : > { %p1821_p3 = scmp.ne.s32.totalorder %s2964_s10, %s1820_s1  ;;  %s1826_s29 = scalar_lea.vmem %s1825_s19, 4096 }
 0x2ac   : > { %p1827_p11 = scmp.lt.s32.totalorder %s2964_s10, %s1825_s19  ;;  %p1828_p0 = scmp.lt.s32.totalorder %s1826_s29, %s1820_s1 }
 0x2ad   : > { %p1822_p5 = pnand %p1821_p3, %p3154_p9 }
 0x2ae   : > { %s2962_s18 = scalar_lea.hbm %s3175_s13, %s1414_s25  ;;  %p1829_p13 = por %p1828_p0, %p1827_p11 }
 0x2af   : > { %p1823_p7 = pneg %p1822_p5 }
 0x2b1   : > { %p1830_p8 = pnand %p1829_p13, %p1823_p7 }
 0x354   : > { %v1546_v9 = vpop.f32.mrb[16].mxu0 }
 0x355   : > { %v967_v50 = vadd.f32 %v1546_v9, %v2382_v58  ;;  %v958_v52 = vpop.f32.mrb[17].mxu0 }
 0x356   : > { %v959_v49 = vadd.f32 %v2382_v58, %v958_v52  ;;  %v1547_v40 = vpop.f32.mrb[18].mxu0  ;;  %v3163_v52 = vld [vmem:[#allocation37_spill] sm:$0xff] }
 0x357   : > { %v1071_v28 = vmul.f32 0.025024459, %v967_v50  ;;  %v970_v53 = vadd.f32 %v1547_v40, %v2382_v58  ;;  %v961_v11 = vpop.f32.mrb[19].mxu0  ;;  %v1664_v50 = vld [vmem:[%s2183_s24 + $0x20] sm:$0xff] }
 0x358   : > { %v1069_v17 = vmul.f32 0.025024459, %v959_v49  ;;  %v962_v39 = vadd.f32 %v2382_v58, %v961_v11  ;;  %v1105_v49 = vadd.f32 %v1664_v50, %v3163_v52  ;;  %v3164_v11 = vld [vmem:[#allocation30_spill] sm:$0xff] }
 0x359   : > { %v1087_v10 = vadd.f32 %v1071_v28, %v2735_v22  ;;  %v1072_v44 = vmul.f32 0.025024459, %v970_v53 }
 0x35a   : > { %v1085_v25 = vadd.f32 %v1069_v17, %v2739_v0  ;;  %v1070_v18 = vmul.f32 0.025024459, %v962_v39  ;;  %v3165_v17 = vld [vmem:[#allocation38_spill] sm:$0xff] }
 0x35b   : > { %v1119_v16 = vmul.f32 0.01, %v1087_v10  ;;  %v1088_v23 = vadd.f32 %v1072_v44, %v2743_v19  ;;  %v1108_v39 = vadd.f32 %v3165_v17, %v3164_v11 }
 0x35c   : > { %v1117_v60 = vmul.f32 0.01, %v1085_v25  ;;  %v1086_v22 = vadd.f32 %v1070_v18, %v2748_v42  ;;  %v1550_v29 = vpop.f32.mrb[20].mxu0 }
 0x35d   : > { %v1135_v7 = vadd.f32 %v1119_v16, %v1103_v55  ;;  %v1120_v0 = vmul.f32 0.01, %v1088_v23  ;;  %v983_v20 = vadd.f32 %v1550_v29, %v2382_v58  ;;  %v974_v13 = vpop.f32.mrb[21].mxu0  ;;  %v1106_v55 = vadd.f32 %v1665_v43, %v3166_v37 }
 0x35e   : > { %v1133_v46 = vadd.f32 %v1117_v60, %v1101_v8  ;;  %v1118_v41 = vmul.f32 0.01, %v1086_v22  ;;  %v975_v2 = vadd.f32 %v2382_v58, %v974_v13  ;;  %v1551_v19 = vpop.f32.mrb[22].mxu0  ;;  %v3168_v13 = vld [vmem:[#allocation41_spill] sm:$0xff] }
 0x35f   : > { %1151 = vst [vmem:[%s2894_s21 + $0x10] sm:$0xff] %v1135_v7  ;;  %v1136_v42 = vadd.f32 %v1120_v0, %v1104_v12  ;;  %v1075_v4 = vmul.f32 0.025024459, %v983_v20  ;;  %v986_v47 = vadd.f32 %v1551_v19, %v2382_v58  ;;  %v977_v15 = vpop.f32.mrb[23].mxu0  ;;  %v1667_v20 = vld [vmem:[%s2183_s24 + $0x40] sm:$0xff] }
 0x360   : > { %1149 = vst [vmem:[%s2894_s21] sm:$0xff] %v1133_v46  ;;  %v1134_v32 = vadd.f32 %v1118_v41, %v1102_v26  ;;  %v1073_v36 = vmul.f32 0.025024459, %v975_v2  ;;  %v978_v21 = vadd.f32 %v2382_v58, %v977_v15  ;;  %v3167_v26 = vld [vmem:[#allocation40_spill] sm:$0xff]  ;;  %v1109_v46 = vadd.f32 %v1667_v20, %v3168_v13 }
 0x361   : > { %1152 = vst [vmem:[%s2894_s21 + $0x18] sm:$0xff] %v1136_v42  ;;  %v1091_v51 = vadd.f32 %v1075_v4, %v2765_v54  ;;  %v1076_v38 = vmul.f32 0.025024459, %v986_v47  ;;  %v1111_v29 = vadd.f32 %v1666_v24, %v3167_v26  ;;  %v1668_v42 = vld [vmem:[%s2183_s24 + $0x58] sm:$0xff] }
 0x362   : > { %1150 = vst [vmem:[%s2894_s21 + $0x8] sm:$0xff] %v1134_v32  ;;  %v1089_v9 = vadd.f32 %v1073_v36, %v2769_v59  ;;  %v1074_v40 = vmul.f32 0.025024459, %v978_v21  ;;  %v3169_v4 = vld [vmem:[#allocation42_spill] sm:$0xff]  ;;  %v1669_v32 = vld [vmem:[%s2183_s24 + $0x48] sm:$0xff]  ;;  %v3170_v36 = vld [vmem:[#allocation43_spill] sm:$0xff] }
 0x363   : > { %v1123_v28 = vmul.f32 0.01, %v1091_v51  ;;  %v1092_v53 = vadd.f32 %v1076_v38, %v2773_v57  ;;  %v1112_v47 = vadd.f32 %v1668_v42, %v3169_v4  ;;  %v1110_v21 = vadd.f32 %v1669_v32, %v3170_v36 }
 0x364   : > { %v1121_v10 = vmul.f32 0.01, %v1089_v9  ;;  %v1090_v54 = vadd.f32 %v1074_v40, %v2778_v1  ;;  %v1554_v44 = vpop.f32.mrb[16].mxu1 }
 0x365   : > { %v1139_v59 = vadd.f32 %v1123_v28, %v1107_v33  ;;  %v1124_v25 = vmul.f32 0.01, %v1092_v53  ;;  %v999_v30 = vadd.f32 %v1554_v44, %v2382_v58  ;;  %v990_v35 = vpop.f32.mrb[17].mxu1  ;;  %v3172_v44 = vld [vmem:[#allocation48_spill] sm:$0xff] }
 0x366   : > { %v1137_v8 = vadd.f32 %v1121_v10, %v1105_v49  ;;  %v1122_v57 = vmul.f32 0.01, %v1090_v54  ;;  %v991_v18 = vadd.f32 %v2382_v58, %v990_v35  ;;  %v1555_v16 = vpop.f32.mrb[18].mxu1  ;;  %v3171_v10 = vld [vmem:[#allocation47_spill] sm:$0xff]  ;;  %v1672_v35 = vld [vmem:[%s2183_s24 + $0x78] sm:$0xff] }
 0x367   : > { %1155 = vst [vmem:[%s2894_s21 + $0x30] sm:$0xff] %v1139_v59  ;;  %v1140_v1 = vadd.f32 %v1124_v25, %v1108_v39  ;;  %v1079_v23 = vmul.f32 0.025024459, %v999_v30  ;;  %v1002_v5 = vadd.f32 %v1555_v16, %v2382_v58  ;;  %v993_v56 = vpop.f32.mrb[19].mxu1  ;;  %v1670_v39 = vld [vmem:[%s2183_s24 + $0x70] sm:$0xff]  ;;  %v3174_v16 = vld [vmem:[#allocation50_spill] sm:$0xff] }
 0x368   : > { %1153 = vst [vmem:[%s2894_s21 + $0x20] sm:$0xff] %v1137_v8  ;;  %v1138_v12 = vadd.f32 %v1122_v57, %v1106_v55  ;;  %v1077_v60 = vmul.f32 0.025024459, %v991_v18  ;;  %v994_v22 = vadd.f32 %v2382_v58, %v993_v56  ;;  %v1115_v54 = vadd.f32 %v1670_v39, %v3171_v10  ;;  %v1671_v55 = vld [vmem:[%s2183_s24 + $0x60] sm:$0xff] }
 0x369   : > { %1156 = vst [vmem:[%s2894_s21 + $0x38] sm:$0xff] %v1140_v1  ;;  %v1095_v31 = vadd.f32 %v1079_v23, %v2793_v63  ;;  %v1080_v7 = vmul.f32 0.025024459, %v1002_v5  ;;  %v1113_v59 = vadd.f32 %v1671_v55, %v3172_v44 }
 0x36a   : > { %1154 = vst [vmem:[%s2894_s21 + $0x28] sm:$0xff] %v1138_v12  ;;  %v1093_v0 = vadd.f32 %v1077_v60, %v2797_v14  ;;  %v1078_v41 = vmul.f32 0.025024459, %v994_v22 }
 0x36b   : > { %v1127_v2 = vmul.f32 0.01, %v1095_v31  ;;  %v1096_v19 = vadd.f32 %v1080_v7, %v2801_v34 }
 0x36c   : > { %v1125_v15 = vmul.f32 0.01, %v1093_v0  ;;  %v1094_v63 = vadd.f32 %v1078_v41, %v2805_v27  ;;  %v1558_v51 = vpop.f32.mrb[20].mxu1 }
 0x36d   : > { %v1143_v14 = vadd.f32 %v1127_v2, %v1111_v29  ;;  %v1128_v62 = vmul.f32 0.01, %v1096_v19  ;;  %v1015_v61 = vadd.f32 %v1558_v51, %v2382_v58  ;;  %v1006_v33 = vpop.f32.mrb[21].mxu1 }
 0x36e   : > { %v1141_v34 = vadd.f32 %v1125_v15, %v1109_v46  ;;  %v1126_v38 = vmul.f32 0.01, %v1094_v63  ;;  %v1007_v9 = vadd.f32 %v2382_v58, %v1006_v33  ;;  %v1559_v50 = vpop.f32.mrb[22].mxu1 }
 0x36f   : > { %1159 = vst [vmem:[%s2894_s21 + $0x50] sm:$0xff] %v1143_v14  ;;  %v1144_v27 = vadd.f32 %v1128_v62, %v1112_v47  ;;  %v1083_v52 = vmul.f32 0.025024459, %v1015_v61  ;;  %v1018_v49 = vadd.f32 %v1559_v50, %v2382_v58  ;;  %v1009_v40 = vpop.f32.mrb[23].mxu1 }
 0x370   : > { %1157 = vst [vmem:[%s2894_s21 + $0x40] sm:$0xff] %v1141_v34  ;;  %v1142_v28 = vadd.f32 %v1126_v38, %v1110_v21  ;;  %v1081_v53 = vmul.f32 0.025024459, %v1007_v9  ;;  %v1010_v11 = vadd.f32 %v2382_v58, %v1009_v40 }
 0x371   : > { %1160 = vst [vmem:[%s2894_s21 + $0x58] sm:$0xff] %v1144_v27  ;;  %v1099_v17 = vadd.f32 %v1083_v52, %v2820_v48  ;;  %v1084_v43 = vmul.f32 0.025024459, %v1018_v49  ;;  %v3173_v48 = vld [vmem:[#allocation49_spill] sm:$0xff] }
 0x372   : > { %1158 = vst [vmem:[%s2894_s21 + $0x48] sm:$0xff] %v1142_v28  ;;  %v1097_v37 = vadd.f32 %v1081_v53, %v2824_v3  ;;  %v1082_v25 = vmul.f32 0.025024459, %v1010_v11  ;;  %v1116_v8 = vadd.f32 %v1672_v35, %v3173_v48  ;;  %v1673_v3 = vld [vmem:[%s2183_s24 + $0x68] sm:$0xff]  ;;  %s1182_s24 = scalar_lea.sflag [#allocation4], %s2176_s17 }
 0x373   : > { %v1131_v30 = vmul.f32 0.01, %v1099_v17  ;;  %v1100_v58 = vadd.f32 %v1084_v43, %v2828_v45  ;;  %v1114_v1 = vadd.f32 %v1673_v3, %v3174_v16 }
 0x374   : > { %v1129_v57 = vmul.f32 0.01, %v1097_v37  ;;  %v1098_v18 = vadd.f32 %v1082_v25, %v2834_v6 }
 0x375   : > { %v1147_v23 = vadd.f32 %v1131_v30, %v1115_v54  ;;  %v1132_v5 = vmul.f32 0.01, %v1100_v58 }
 0x376   : > { %v1145_v56 = vadd.f32 %v1129_v57, %v1113_v59  ;;  %v1130_v12 = vmul.f32 0.01, %v1098_v18 }
 0x377   : > { %1163 = vst [vmem:[%s2894_s21 + $0x70] sm:$0xff] %v1147_v23  ;;  %v1148_v45 = vadd.f32 %v1132_v5, %v1116_v8 }
 0x378   : > { %1161 = vst [vmem:[%s2894_s21 + $0x60] sm:$0xff] %v1145_v56  ;;  %v1146_v60 = vadd.f32 %v1130_v12, %v1114_v1 }
 0x379   : > { %1164 = vst [vmem:[%s2894_s21 + $0x78] sm:$0xff] %v1148_v45 }
 0x37a   : > { %1162 = vst [vmem:[%s2894_s21 + $0x68] sm:$0xff] %v1146_v60 }
 0x37b   : > { %1833 = shalt.err (!%p1830_p8)
}
 0x37c   : > { %s1834_s25 = scalar_lea.hbm %s2962_s18, 2048  ;;  %s1838_s9 = scalar_lea.hbm %s3175_s13, 4096 }
 0x37d   : > { %p1835_p10 = scmp.ne.s32.totalorder %s2962_s18, %s1834_s25  ;;  %p1839_p4 = scmp.lt.u32.totalorder %s2962_s18, %s3175_s13 }
 0x37e   : > { %p1840_p12 = scmp.lt.u32.totalorder %s1838_s9, %s1834_s25  ;;  %p1842_p3 = scmp.lt.u32.totalorder %s1834_s25, %s2962_s18 }
 0x37f   : > { %p1836_p1 = pnand %p1835_p10, %p3154_p9 }
 0x380   : > { %p1841_p6 = por %p1840_p12, %p1839_p4 }
 0x381   : > { %p1837_p2 = pneg %p1836_p1 }
 0x382   : > { %p1843_p5 = por %p1842_p3, %p1841_p6 }
 0x384   : > { %p1844_p7 = pnand %p1843_p5, %p1837_p2 }
 0x386   : > { %1847 = shalt.err (!%p1844_p7)
}
 0x387   : > { %1586 = dma.vmem_to_hbm [thread:$0]  (%p3154_p9), %s2964_s10, 2048, %s2962_s18, %s1182_s24, %s1909_s26, %s1909_s26, %s1910_s6  }
 0x388 PF: > { %s3176_s15 = sld [smem:[#allocation18_spill]]  ;;  %s3177_s27 = sld [smem:[#allocation22_spill]] }
 0x389   : > { %s3178_s5 = sld [smem:[#allocation19_spill]] }
 0x38e   : > { %s1231_s21 = sand.u32 1, %s3176_s15   ;;  %p3179_p11 = scmp.ne.s32.totalorder %s3177_s27, 0 }
 0x38f   : > { %p3180_p0 = scmp.ge.s32.totalorder %s3178_s5, 2  ;;  %s1232_s7 = scalar_lea.sflag [#allocation4], %s1231_s21 }
 0x391   : > { %p1605_p13 = pnand %p3180_p0, %p3179_p11 }
 0x393   : > { %1877 = dma.done.wait (!%p1605_p13), %s1232_s7, 2048  }
 0x394   : > { %1879 = vsyncadd (!%p1605_p13), %s1232_s7, 4294965248  ;;  %s1241_s12 = scalar_lea.sflag [#allocation12], %s1231_s21 }
 0x395   : > { %1881 = dma.done.wait (!%p1605_p13), %s1241_s12, 2048  }
 0x396   : > { %1883 = vsyncadd (!%p1605_p13), %s1241_s12, 4294965248  ;;  %s3181_s24 = sld [smem:[#allocation20_spill]]  ;;  %s3182_s17 = sld [smem:[#allocation21_spill]] }
 0x397   : > { %s3183_s21 = smov %s1890_s22  ;;  %s3184_s22 = smov %s1894_s23 }
 0x39c   : > { %p27_p9 = scmp.ge.s32.totalorder %s3181_s24, 4   ;;  %s3185_s23 = smov %s3182_s17 }
 0x39e   :  { %29 = sbr.rel (!%p27_p9) target bundleno = 14 (0xe), region = 130 }
 0x3a5   :  { %1246 = vsyncpa [#allocation3], 1 }
 0x3a6   :  { %1248 = vsyncpa [#allocation3 + $0x1], 1 }
 0x3a7   :  { %1249 = vsyncpa [#allocation6], 1 }
 0x3a8   :  { %1251 = vsyncpa [#allocation6 + $0x1], 1 }
 0x3a9   :  { %1252 = vsyncpa [#allocation9], 1 }
 0x3aa   :  { %1253 = vsyncpa [#allocation4], 1 }
 0x3ab   :  { %1255 = vsyncpa [#allocation4 + $0x1], 1 }
 0x3ac   :  { %1256 = vsyncpa [#allocation12], 1 }
 0x3ad   :  { %1258 = vsyncpa [#allocation12 + $0x1], 1 }

</bundles_post_ra>
